<compile_context>
chip_gen: v7x
topology: tpu7x:2x2x1
jax: 0.10.0
libtpu: 0.0.40
codegen_flags: <defaults>
</compile_context>

<pallas_src>
import numpy as np
import jax
import jax.numpy as jnp
from jax import lax
from jax.experimental import pallas as pl
from jax.experimental.pallas import tpu as pltpu


def _round_up(x, m):
    return ((x + m - 1) // m) * m


def get_loss_weights(output_dim, prediction_length, loss_discount, loss_weights=None):
    # Registered buffer from __init__; not used by forward(), kept for parity.
    dim_weights = jnp.ones((output_dim,), dtype=jnp.float32)
    if loss_weights is not None:
        for idx, w in loss_weights.items():
            dim_weights = dim_weights.at[idx].set(float(w))
    discounts = loss_discount ** jnp.arange(prediction_length, dtype=jnp.float32)
    discounts = discounts / jnp.mean(discounts)
    return jnp.einsum("t,d->td", discounts, dim_weights)


# ---------------------------------------------------------------------------
# Single-invocation fused reverse-diffusion kernel (no grid).
#   per step s:  eps = MLP(x)       (time embedding folded into hidden bias)
#                x   = c1*(x - c2*eps) + sigma*noise[s]
#                x[:, 0, :] = cond[0]
# x lives in vregs / compiler-managed VMEM for the whole loop.
# ---------------------------------------------------------------------------
def _make_denoise_kernel(n_steps, B, T, Dp, inv_sqrt_alpha, eps_coef, sigma,
                         with_chain):
    c1 = [float(v) for v in inv_sqrt_alpha]   # schedule baked in as constants
    c2 = [float(v) for v in eps_coef]
    sg = [float(v) for v in sigma]            # sg[-1] == 0.0 (no noise, last step)

    def kernel(cond_ref, x0_ref, noise_ref, w1_ref, b1t_ref, w2_ref, b2_ref,
               out_ref):
        x = x0_ref[...]                        # (B, T, Dp) f32, carried as a value
        cond = cond_ref[...]                   # (B, 1, Dp)
        # timestep-0 mask for apply_conditioning (hoisted out of the loop)
        row0 = lax.broadcasted_iota(jnp.int32, (B, T, Dp), 1) == 0

        for s in range(n_steps):               # unrolled: n_steps is small & static
            xf = x.reshape(B * T, Dp)          # free view (B*T % 8 == 0, Dp == 128)
            # --- denoiser MLP (MXU, f32) ---
            h = jnp.dot(xf, w1_ref[...], preferred_element_type=jnp.float32)
            h = jnp.maximum(h + b1t_ref[s], 0.0)   # bias + time embedding, folded
            eps = jnp.dot(h, w2_ref[...], preferred_element_type=jnp.float32)
            eps = (eps + b2_ref[...]).reshape(B, T, Dp)
            # --- DDPM posterior-mean update (VPU) ---
            x = c1[s] * (x - c2[s] * eps) + sg[s] * noise_ref[s]
            # apply_conditioning: overwrite timestep 0 with cond[0]
            x = jnp.where(row0, cond, x)
            if with_chain:
                out_ref[s] = x                 # chain is the ONLY output; final = chain[-1]

        if not with_chain:
            out_ref[...] = x

    return kernel


def _build_sampler(n_steps, B, T, Dp, Hp, inv_sqrt_alpha, eps_coef, sigma,
                   with_chain):
    kernel = _make_denoise_kernel(n_steps, B, T, Dp, inv_sqrt_alpha, eps_coef,
                                  sigma, with_chain)

    if with_chain:
        out_shape = jax.ShapeDtypeStruct((n_steps, B, T, Dp), jnp.float32)
    else:
        out_shape = jax.ShapeDtypeStruct((B, T, Dp), jnp.float32)

    n_inputs = 7
    in_specs = [pl.BlockSpec(memory_space=pltpu.MemorySpace.VMEM)
                for _ in range(n_inputs)]
    out_specs = pl.BlockSpec(memory_space=pltpu.MemorySpace.VMEM)

    flops = n_steps * (4 * B * T * Dp * Hp + 10 * B * T * Dp)
    in_bytes = 4 * (B * Dp + B * T * Dp + n_steps * B * T * Dp +
                    Dp * Hp + n_steps * Hp + Hp * Dp + Dp)
    out_bytes = 4 * (n_steps * B * T * Dp if with_chain else B * T * Dp)

    call = pl.pallas_call(
        kernel,
        out_shape=out_shape,
        in_specs=in_specs,
        out_specs=out_specs,
        cost_estimate=pl.CostEstimate(
            flops=flops, transcendentals=0,
            bytes_accessed=in_bytes + out_bytes),
    )
    return jax.jit(call)


# ---------------------------------------------------------------------------
# GenerativeModel in JAX: holds denoiser params + diffusion schedule and
# implements conditional_sample with the single fused Pallas kernel.
# ---------------------------------------------------------------------------
class GenerativeModelPallas:
    def __init__(self, input_dim, output_dim, prediction_length, history_length,
                 hidden_dim=64, n_timesteps=8, loss_discount=1.0,
                 loss_weights=None, has_query=False):
        self.input_dim = input_dim
        self.output_dim = output_dim
        self.prediction_length = prediction_length
        self.history_length = history_length
        self.has_query = has_query
        self.hidden_dim = hidden_dim
        self.n_timesteps = n_timesteps
        self.loss_weights = get_loss_weights(
            output_dim, prediction_length, loss_discount, loss_weights)

        # lane-dense padded sizes (multiples of 128)
        self.d_pad = _round_up(output_dim, 128)
        self.h_pad = _round_up(hidden_dim, 128)

        # Deterministic denoiser ("self.model") params at true sizes,
        # zero-padded to lane-dense shapes for the kernel.
        k1, k2 = jax.random.split(jax.random.PRNGKey(0))
        w1 = np.asarray(jax.random.normal(k1, (output_dim, hidden_dim),
                                          jnp.float32)) / np.sqrt(output_dim)
        w2 = np.asarray(jax.random.normal(k2, (hidden_dim, output_dim),
                                          jnp.float32)) / np.sqrt(hidden_dim)
        b1 = np.zeros((hidden_dim,), np.float32)
        b2 = np.zeros((output_dim,), np.float32)

        w1_p = np.zeros((self.d_pad, self.h_pad), np.float32)
        w1_p[:output_dim, :hidden_dim] = w1
        w2_p = np.zeros((self.h_pad, self.d_pad), np.float32)
        w2_p[:hidden_dim, :output_dim] = w2
        b2_p = np.zeros((1, self.d_pad), np.float32)
        b2_p[0, :output_dim] = b2

        # Linear beta schedule.
        betas = np.linspace(1e-4, 2e-2, n_timesteps, dtype=np.float64)
        alphas = 1.0 - betas
        alphas_cum = np.cumprod(alphas)
        inv_sqrt_alpha = (1.0 / np.sqrt(alphas)).astype(np.float32)
        eps_coef = (betas / np.sqrt(1.0 - alphas_cum)).astype(np.float32)
        sigma = np.sqrt(betas).astype(np.float32)
        sigma[0] = 0.0                      # no noise on the final (t=0) step

        # Per-step tables in grid-step order: step s <-> diffusion time t = n-1-s.
        ts = list(reversed(range(n_timesteps)))
        self._c1 = inv_sqrt_alpha[ts]
        self._c2 = eps_coef[ts]
        self._sg = sigma[ts]
        b1t = np.zeros((n_timesteps, 1, self.h_pad), np.float32)
        for s, t in enumerate(ts):
            b1t[s, 0, :hidden_dim] = b1 + self._time_embedding(float(t))

        self.w1_p = jnp.asarray(w1_p)
        self.w2_p = jnp.asarray(w2_p)
        self.b2_p = jnp.asarray(b2_p)
        self.b1t = jnp.asarray(b1t)

        self._samplers = {}                 # (B, T_pad, with_chain) -> jitted callable

    def _time_embedding(self, t):
        # Sinusoidal embedding of the diffusion step, shape (hidden_dim,).
        half = self.hidden_dim // 2
        freqs = np.exp(-np.log(10000.0) * np.arange(half) / max(half - 1, 1))
        ang = t * freqs
        emb = np.concatenate([np.sin(ang), np.cos(ang)]).astype(np.float32)
        if emb.shape[0] < self.hidden_dim:
            emb = np.pad(emb, (0, self.hidden_dim - emb.shape[0]))
        return emb

    def _get_sampler(self, B, T_pad, with_chain):
        key = (B, T_pad, with_chain)
        if key not in self._samplers:
            self._samplers[key] = _build_sampler(
                self.n_timesteps, B, T_pad, self.d_pad, self.h_pad,
                self._c1, self._c2, self._sg, with_chain)
        return self._samplers[key]

    def conditional_sample(self, cond, shape, query=None, verbose=True,
                           return_chain=False, key=None, **kwargs):
        B, T, D = shape
        Dp = self.d_pad
        Tp = _round_up(T, 8)                 # keep reshape(B*T, Dp) a free view
        cond0 = jnp.asarray(cond[0], jnp.float32)                  # (B, D)

        if key is None:
            key = jax.random.PRNGKey(1)
        kx, kn = jax.random.split(key)
        x0 = jax.random.normal(kx, (B, T, D), jnp.float32)
        noise = jax.random.normal(kn, (self.n_timesteps, B, T, D), jnp.float32)

        # apply_conditioning on the initial noise
        x0 = x0.at[:, 0, :].set(cond0)

        # zero-pad T to a sublane multiple and the feature dim to 128 lanes
        pad3 = ((0, 0), (0, Tp - T), (0, Dp - D))
        x0_p = jnp.pad(x0, pad3)
        noise_p = jnp.pad(noise, ((0, 0),) + pad3)
        cond_p = jnp.pad(cond0, ((0, 0), (0, Dp - D)))[:, None, :]  # (B, 1, Dp)

        sampler = self._get_sampler(B, Tp, return_chain)
        out = sampler(cond_p, x0_p, noise_p, self.w1_p, self.b1t,
                      self.w2_p, self.b2_p)

        if return_chain:
            chain_p = out                                           # (n, B, Tp, Dp)
            x = chain_p[-1, :, :T, :D]
            chain = jnp.concatenate([x0_p[None], chain_p], axis=0)[:, :, :T, :D]
            return x, chain
        return out[:, :T, :D]

    def forward(self, cond, query=None, verbose=True, return_chain=False, **kwargs):
        batch_size = len(cond[0])
        shape = (batch_size, self.prediction_length, self.output_dim)
        return self.conditional_sample(cond, shape, query=query, verbose=verbose,
                                       return_chain=return_chain, **kwargs)

    __call__ = forward


if __name__ == "__main__":
    B = 2            # batch
    D = 32           # output_dim (== input_dim here)
    T = 8            # prediction_length

    model = GenerativeModelPallas(
        input_dim=D, output_dim=D, prediction_length=T, history_length=1,
        hidden_dim=64, n_timesteps=8, loss_discount=0.99)

    cond0 = jax.random.normal(jax.random.PRNGKey(0), (B, D), jnp.float32)
    cond = {0: cond0}

    out = model(cond, verbose=False, return_chain=False)
    out = jax.block_until_ready(out)

    assert out.shape == (B, T, D), out.shape
    assert out.dtype == jnp.float32
    # conditioning must be exactly preserved at timestep 0
    assert bool(jnp.allclose(out[:, 0, :], cond0))
    assert bool(jnp.all(jnp.isfinite(out)))
    print("KERNEL_OK")
</pallas_src>

<mosaic_0001>
module attributes {stable_mosaic.version = 11 : i64} {
  func.func @kernel(%arg0: memref<2x1x128xf32, #tpu.memory_space<vmem>>, %arg1: memref<2x8x128xf32, #tpu.memory_space<vmem>>, %arg2: memref<8x2x8x128xf32, #tpu.memory_space<vmem>>, %arg3: memref<128x128xf32, #tpu.memory_space<vmem>>, %arg4: memref<8x1x128xf32, #tpu.memory_space<vmem>>, %arg5: memref<128x128xf32, #tpu.memory_space<vmem>>, %arg6: memref<1x128xf32, #tpu.memory_space<vmem>>, %arg7: memref<2x8x128xf32, #tpu.memory_space<vmem>>) attributes {dimension_semantics = [], scalar_prefetch = 0 : i64, scratch_operands = 0 : i64, tpu.core_type = #tpu.core_type<tc>} {
    %c0 = arith.constant 0 : index
    %c0_0 = arith.constant 0 : index
    %c0_1 = arith.constant 0 : index
    %0 = vector.load %arg1[%c0, %c0_0, %c0_1] : memref<2x8x128xf32, #tpu.memory_space<vmem>>, vector<2x8x128xf32>
    %c0_2 = arith.constant 0 : index
    %c0_3 = arith.constant 0 : index
    %c0_4 = arith.constant 0 : index
    %1 = vector.load %arg0[%c0_2, %c0_3, %c0_4] : memref<2x1x128xf32, #tpu.memory_space<vmem>>, vector<2x1x128xf32>
    %2 = tpu.iota {dimensions = array<i32: 1>} : vector<2x8x128xi32>
    %c0_i32 = arith.constant 0 : i32
    %3 = vector.broadcast %c0_i32 : i32 to vector<2x8x128xi32>
    %4 = arith.cmpi eq, %2, %3 : vector<2x8x128xi32>
    %5 = vector.shape_cast %0 : vector<2x8x128xf32> to vector<16x128xf32>
    %c0_5 = arith.constant 0 : index
    %c0_6 = arith.constant 0 : index
    %6 = vector.load %arg3[%c0_5, %c0_6] : memref<128x128xf32, #tpu.memory_space<vmem>>, vector<128x128xf32>
    %cst = arith.constant dense<0.000000e+00> : vector<16x128xf32>
    %7 = tpu.matmul %5, %6, %cst {dimension_numbers = #tpu.dot_dimension_numbers<[1], [0], [0], [1], [0, 0, 1, 1], [], []>} : vector<16x128xf32>, vector<128x128xf32>, vector<16x128xf32> -> vector<16x128xf32>
    %c0_7 = arith.constant 0 : index
    %c0_8 = arith.constant 0 : index
    %c0_9 = arith.constant 0 : index
    %8 = vector.load %arg4[%c0_7, %c0_8, %c0_9] : memref<8x1x128xf32, #tpu.memory_space<vmem>>, vector<1x1x128xf32>
    %9 = vector.shape_cast %8 : vector<1x1x128xf32> to vector<1x128xf32>
    %10 = vector.broadcast %9 : vector<1x128xf32> to vector<16x128xf32>
    %11 = arith.addf %7, %10 : vector<16x128xf32>
    %cst_10 = arith.constant 0.000000e+00 : f32
    %12 = vector.broadcast %cst_10 : f32 to vector<16x128xf32>
    %13 = arith.maximumf %11, %12 : vector<16x128xf32>
    %c0_11 = arith.constant 0 : index
    %c0_12 = arith.constant 0 : index
    %14 = vector.load %arg5[%c0_11, %c0_12] : memref<128x128xf32, #tpu.memory_space<vmem>>, vector<128x128xf32>
    %cst_13 = arith.constant dense<0.000000e+00> : vector<16x128xf32>
    %15 = tpu.matmul %13, %14, %cst_13 {dimension_numbers = #tpu.dot_dimension_numbers<[1], [0], [0], [1], [0, 0, 1, 1], [], []>} : vector<16x128xf32>, vector<128x128xf32>, vector<16x128xf32> -> vector<16x128xf32>
    %c0_14 = arith.constant 0 : index
    %c0_15 = arith.constant 0 : index
    %16 = vector.load %arg6[%c0_14, %c0_15] : memref<1x128xf32, #tpu.memory_space<vmem>>, vector<1x128xf32>
    %17 = vector.broadcast %16 : vector<1x128xf32> to vector<16x128xf32>
    %18 = arith.addf %15, %17 : vector<16x128xf32>
    %19 = vector.shape_cast %18 : vector<16x128xf32> to vector<2x8x128xf32>
    %cst_16 = arith.constant 7.170910e-02 : f32
    %20 = vector.broadcast %cst_16 : f32 to vector<2x8x128xf32>
    %21 = arith.mulf %20, %19 : vector<2x8x128xf32>
    %22 = arith.subf %0, %21 : vector<2x8x128xf32>
    %cst_17 = arith.constant 1.01015258 : f32
    %23 = vector.broadcast %cst_17 : f32 to vector<2x8x128xf32>
    %24 = arith.mulf %23, %22 : vector<2x8x128xf32>
    %c0_18 = arith.constant 0 : index
    %c0_19 = arith.constant 0 : index
    %c0_20 = arith.constant 0 : index
    %c0_21 = arith.constant 0 : index
    %25 = vector.load %arg2[%c0_18, %c0_19, %c0_20, %c0_21] : memref<8x2x8x128xf32, #tpu.memory_space<vmem>>, vector<1x2x8x128xf32>
    %26 = vector.shape_cast %25 : vector<1x2x8x128xf32> to vector<2x8x128xf32>
    %cst_22 = arith.constant 0.141421363 : f32
    %27 = vector.broadcast %cst_22 : f32 to vector<2x8x128xf32>
    %28 = arith.mulf %27, %26 : vector<2x8x128xf32>
    %29 = arith.addf %24, %28 : vector<2x8x128xf32>
    %30 = vector.shape_cast %1 : vector<2x1x128xf32> to vector<2x1x128xf32>
    %31 = vector.broadcast %30 : vector<2x1x128xf32> to vector<2x8x128xf32>
    %32 = arith.select %4, %31, %29 : vector<2x8x128xi1>, vector<2x8x128xf32>
    %33 = vector.shape_cast %32 : vector<2x8x128xf32> to vector<16x128xf32>
    %c0_23 = arith.constant 0 : index
    %c0_24 = arith.constant 0 : index
    %34 = vector.load %arg3[%c0_23, %c0_24] : memref<128x128xf32, #tpu.memory_space<vmem>>, vector<128x128xf32>
    %cst_25 = arith.constant dense<0.000000e+00> : vector<16x128xf32>
    %35 = tpu.matmul %33, %34, %cst_25 {dimension_numbers = #tpu.dot_dimension_numbers<[1], [0], [0], [1], [0, 0, 1, 1], [], []>} : vector<16x128xf32>, vector<128x128xf32>, vector<16x128xf32> -> vector<16x128xf32>
    %c1 = arith.constant 1 : index
    %c0_26 = arith.constant 0 : index
    %c0_27 = arith.constant 0 : index
    %36 = vector.load %arg4[%c1, %c0_26, %c0_27] : memref<8x1x128xf32, #tpu.memory_space<vmem>>, vector<1x1x128xf32>
    %37 = vector.shape_cast %36 : vector<1x1x128xf32> to vector<1x128xf32>
    %38 = vector.broadcast %37 : vector<1x128xf32> to vector<16x128xf32>
    %39 = arith.addf %35, %38 : vector<16x128xf32>
    %cst_28 = arith.constant 0.000000e+00 : f32
    %40 = vector.broadcast %cst_28 : f32 to vector<16x128xf32>
    %41 = arith.maximumf %39, %40 : vector<16x128xf32>
    %c0_29 = arith.constant 0 : index
    %c0_30 = arith.constant 0 : index
    %42 = vector.load %arg5[%c0_29, %c0_30] : memref<128x128xf32, #tpu.memory_space<vmem>>, vector<128x128xf32>
    %cst_31 = arith.constant dense<0.000000e+00> : vector<16x128xf32>
    %43 = tpu.matmul %41, %42, %cst_31 {dimension_numbers = #tpu.dot_dimension_numbers<[1], [0], [0], [1], [0, 0, 1, 1], [], []>} : vector<16x128xf32>, vector<128x128xf32>, vector<16x128xf32> -> vector<16x128xf32>
    %c0_32 = arith.constant 0 : index
    %c0_33 = arith.constant 0 : index
    %44 = vector.load %arg6[%c0_32, %c0_33] : memref<1x128xf32, #tpu.memory_space<vmem>>, vector<1x128xf32>
    %45 = vector.broadcast %44 : vector<1x128xf32> to vector<16x128xf32>
    %46 = arith.addf %43, %45 : vector<16x128xf32>
    %47 = vector.shape_cast %46 : vector<16x128xf32> to vector<2x8x128xf32>
    %cst_34 = arith.constant 0.0706545189 : f32
    %48 = vector.broadcast %cst_34 : f32 to vector<2x8x128xf32>
    %49 = arith.mulf %48, %47 : vector<2x8x128xf32>
    %50 = arith.subf %32, %49 : vector<2x8x128xf32>
    %cst_35 = arith.constant 1.0086906 : f32
    %51 = vector.broadcast %cst_35 : f32 to vector<2x8x128xf32>
    %52 = arith.mulf %51, %50 : vector<2x8x128xf32>
    %c1_36 = arith.constant 1 : index
    %c0_37 = arith.constant 0 : index
    %c0_38 = arith.constant 0 : index
    %c0_39 = arith.constant 0 : index
    %53 = vector.load %arg2[%c1_36, %c0_37, %c0_38, %c0_39] : memref<8x2x8x128xf32, #tpu.memory_space<vmem>>, vector<1x2x8x128xf32>
    %54 = vector.shape_cast %53 : vector<1x2x8x128xf32> to vector<2x8x128xf32>
    %cst_40 = arith.constant 0.130985275 : f32
    %55 = vector.broadcast %cst_40 : f32 to vector<2x8x128xf32>
    %56 = arith.mulf %55, %54 : vector<2x8x128xf32>
    %57 = arith.addf %52, %56 : vector<2x8x128xf32>
    %58 = vector.shape_cast %1 : vector<2x1x128xf32> to vector<2x1x128xf32>
    %59 = vector.broadcast %58 : vector<2x1x128xf32> to vector<2x8x128xf32>
    %60 = arith.select %4, %59, %57 : vector<2x8x128xi1>, vector<2x8x128xf32>
    %61 = vector.shape_cast %60 : vector<2x8x128xf32> to vector<16x128xf32>
    %c0_41 = arith.constant 0 : index
    %c0_42 = arith.constant 0 : index
    %62 = vector.load %arg3[%c0_41, %c0_42] : memref<128x128xf32, #tpu.memory_space<vmem>>, vector<128x128xf32>
    %cst_43 = arith.constant dense<0.000000e+00> : vector<16x128xf32>
    %63 = tpu.matmul %61, %62, %cst_43 {dimension_numbers = #tpu.dot_dimension_numbers<[1], [0], [0], [1], [0, 0, 1, 1], [], []>} : vector<16x128xf32>, vector<128x128xf32>, vector<16x128xf32> -> vector<16x128xf32>
    %c2 = arith.constant 2 : index
    %c0_44 = arith.constant 0 : index
    %c0_45 = arith.constant 0 : index
    %64 = vector.load %arg4[%c2, %c0_44, %c0_45] : memref<8x1x128xf32, #tpu.memory_space<vmem>>, vector<1x1x128xf32>
    %65 = vector.shape_cast %64 : vector<1x1x128xf32> to vector<1x128xf32>
    %66 = vector.broadcast %65 : vector<1x128xf32> to vector<16x128xf32>
    %67 = arith.addf %63, %66 : vector<16x128xf32>
    %cst_46 = arith.constant 0.000000e+00 : f32
    %68 = vector.broadcast %cst_46 : f32 to vector<16x128xf32>
    %69 = arith.maximumf %67, %68 : vector<16x128xf32>
    %c0_47 = arith.constant 0 : index
    %c0_48 = arith.constant 0 : index
    %70 = vector.load %arg5[%c0_47, %c0_48] : memref<128x128xf32, #tpu.memory_space<vmem>>, vector<128x128xf32>
    %cst_49 = arith.constant dense<0.000000e+00> : vector<16x128xf32>
    %71 = tpu.matmul %69, %70, %cst_49 {dimension_numbers = #tpu.dot_dimension_numbers<[1], [0], [0], [1], [0, 0, 1, 1], [], []>} : vector<16x128xf32>, vector<128x128xf32>, vector<16x128xf32> -> vector<16x128xf32>
    %c0_50 = arith.constant 0 : index
    %c0_51 = arith.constant 0 : index
    %72 = vector.load %arg6[%c0_50, %c0_51] : memref<1x128xf32, #tpu.memory_space<vmem>>, vector<1x128xf32>
    %73 = vector.broadcast %72 : vector<1x128xf32> to vector<16x128xf32>
    %74 = arith.addf %71, %73 : vector<16x128xf32>
    %75 = vector.shape_cast %74 : vector<16x128xf32> to vector<2x8x128xf32>
    %cst_52 = arith.constant 0.0694019496 : f32
    %76 = vector.broadcast %cst_52 : f32 to vector<2x8x128xf32>
    %77 = arith.mulf %76, %75 : vector<2x8x128xf32>
    %78 = arith.subf %60, %77 : vector<2x8x128xf32>
    %cst_53 = arith.constant 1.00723493 : f32
    %79 = vector.broadcast %cst_53 : f32 to vector<2x8x128xf32>
    %80 = arith.mulf %79, %78 : vector<2x8x128xf32>
    %c2_54 = arith.constant 2 : index
    %c0_55 = arith.constant 0 : index
    %c0_56 = arith.constant 0 : index
    %c0_57 = arith.constant 0 : index
    %81 = vector.load %arg2[%c2_54, %c0_55, %c0_56, %c0_57] : memref<8x2x8x128xf32, #tpu.memory_space<vmem>>, vector<1x2x8x128xf32>
    %82 = vector.shape_cast %81 : vector<1x2x8x128xf32> to vector<2x8x128xf32>
    %cst_58 = arith.constant 0.119642325 : f32
    %83 = vector.broadcast %cst_58 : f32 to vector<2x8x128xf32>
    %84 = arith.mulf %83, %82 : vector<2x8x128xf32>
    %85 = arith.addf %80, %84 : vector<2x8x128xf32>
    %86 = vector.shape_cast %1 : vector<2x1x128xf32> to vector<2x1x128xf32>
    %87 = vector.broadcast %86 : vector<2x1x128xf32> to vector<2x8x128xf32>
    %88 = arith.select %4, %87, %85 : vector<2x8x128xi1>, vector<2x8x128xf32>
    %89 = vector.shape_cast %88 : vector<2x8x128xf32> to vector<16x128xf32>
    %c0_59 = arith.constant 0 : index
    %c0_60 = arith.constant 0 : index
    %90 = vector.load %arg3[%c0_59, %c0_60] : memref<128x128xf32, #tpu.memory_space<vmem>>, vector<128x128xf32>
    %cst_61 = arith.constant dense<0.000000e+00> : vector<16x128xf32>
    %91 = tpu.matmul %89, %90, %cst_61 {dimension_numbers = #tpu.dot_dimension_numbers<[1], [0], [0], [1], [0, 0, 1, 1], [], []>} : vector<16x128xf32>, vector<128x128xf32>, vector<16x128xf32> -> vector<16x128xf32>
    %c3 = arith.constant 3 : index
    %c0_62 = arith.constant 0 : index
    %c0_63 = arith.constant 0 : index
    %92 = vector.load %arg4[%c3, %c0_62, %c0_63] : memref<8x1x128xf32, #tpu.memory_space<vmem>>, vector<1x1x128xf32>
    %93 = vector.shape_cast %92 : vector<1x1x128xf32> to vector<1x128xf32>
    %94 = vector.broadcast %93 : vector<1x128xf32> to vector<16x128xf32>
    %95 = arith.addf %91, %94 : vector<16x128xf32>
    %cst_64 = arith.constant 0.000000e+00 : f32
    %96 = vector.broadcast %cst_64 : f32 to vector<16x128xf32>
    %97 = arith.maximumf %95, %96 : vector<16x128xf32>
    %c0_65 = arith.constant 0 : index
    %c0_66 = arith.constant 0 : index
    %98 = vector.load %arg5[%c0_65, %c0_66] : memref<128x128xf32, #tpu.memory_space<vmem>>, vector<128x128xf32>
    %cst_67 = arith.constant dense<0.000000e+00> : vector<16x128xf32>
    %99 = tpu.matmul %97, %98, %cst_67 {dimension_numbers = #tpu.dot_dimension_numbers<[1], [0], [0], [1], [0, 0, 1, 1], [], []>} : vector<16x128xf32>, vector<128x128xf32>, vector<16x128xf32> -> vector<16x128xf32>
    %c0_68 = arith.constant 0 : index
    %c0_69 = arith.constant 0 : index
    %100 = vector.load %arg6[%c0_68, %c0_69] : memref<1x128xf32, #tpu.memory_space<vmem>>, vector<1x128xf32>
    %101 = vector.broadcast %100 : vector<1x128xf32> to vector<16x128xf32>
    %102 = arith.addf %99, %101 : vector<16x128xf32>
    %103 = vector.shape_cast %102 : vector<16x128xf32> to vector<2x8x128xf32>
    %cst_70 = arith.constant 0.0677899569 : f32
    %104 = vector.broadcast %cst_70 : f32 to vector<2x8x128xf32>
    %105 = arith.mulf %104, %103 : vector<2x8x128xf32>
    %106 = arith.subf %88, %105 : vector<2x8x128xf32>
    %cst_71 = arith.constant 1.00578558 : f32
    %107 = vector.broadcast %cst_71 : f32 to vector<2x8x128xf32>
    %108 = arith.mulf %107, %106 : vector<2x8x128xf32>
    %c3_72 = arith.constant 3 : index
    %c0_73 = arith.constant 0 : index
    %c0_74 = arith.constant 0 : index
    %c0_75 = arith.constant 0 : index
    %109 = vector.load %arg2[%c3_72, %c0_73, %c0_74, %c0_75] : memref<8x2x8x128xf32, #tpu.memory_space<vmem>>, vector<1x2x8x128xf32>
    %110 = vector.shape_cast %109 : vector<1x2x8x128xf32> to vector<2x8x128xf32>
    %cst_76 = arith.constant 0.107104756 : f32
    %111 = vector.broadcast %cst_76 : f32 to vector<2x8x128xf32>
    %112 = arith.mulf %111, %110 : vector<2x8x128xf32>
    %113 = arith.addf %108, %112 : vector<2x8x128xf32>
    %114 = vector.shape_cast %1 : vector<2x1x128xf32> to vector<2x1x128xf32>
    %115 = vector.broadcast %114 : vector<2x1x128xf32> to vector<2x8x128xf32>
    %116 = arith.select %4, %115, %113 : vector<2x8x128xi1>, vector<2x8x128xf32>
    %117 = vector.shape_cast %116 : vector<2x8x128xf32> to vector<16x128xf32>
    %c0_77 = arith.constant 0 : index
    %c0_78 = arith.constant 0 : index
    %118 = vector.load %arg3[%c0_77, %c0_78] : memref<128x128xf32, #tpu.memory_space<vmem>>, vector<128x128xf32>
    %cst_79 = arith.constant dense<0.000000e+00> : vector<16x128xf32>
    %119 = tpu.matmul %117, %118, %cst_79 {dimension_numbers = #tpu.dot_dimension_numbers<[1], [0], [0], [1], [0, 0, 1, 1], [], []>} : vector<16x128xf32>, vector<128x128xf32>, vector<16x128xf32> -> vector<16x128xf32>
    %c4 = arith.constant 4 : index
    %c0_80 = arith.constant 0 : index
    %c0_81 = arith.constant 0 : index
    %120 = vector.load %arg4[%c4, %c0_80, %c0_81] : memref<8x1x128xf32, #tpu.memory_space<vmem>>, vector<1x1x128xf32>
    %121 = vector.shape_cast %120 : vector<1x1x128xf32> to vector<1x128xf32>
    %122 = vector.broadcast %121 : vector<1x128xf32> to vector<16x128xf32>
    %123 = arith.addf %119, %122 : vector<16x128xf32>
    %cst_82 = arith.constant 0.000000e+00 : f32
    %124 = vector.broadcast %cst_82 : f32 to vector<16x128xf32>
    %125 = arith.maximumf %123, %124 : vector<16x128xf32>
    %c0_83 = arith.constant 0 : index
    %c0_84 = arith.constant 0 : index
    %126 = vector.load %arg5[%c0_83, %c0_84] : memref<128x128xf32, #tpu.memory_space<vmem>>, vector<128x128xf32>
    %cst_85 = arith.constant dense<0.000000e+00> : vector<16x128xf32>
    %127 = tpu.matmul %125, %126, %cst_85 {dimension_numbers = #tpu.dot_dimension_numbers<[1], [0], [0], [1], [0, 0, 1, 1], [], []>} : vector<16x128xf32>, vector<128x128xf32>, vector<16x128xf32> -> vector<16x128xf32>
    %c0_86 = arith.constant 0 : index
    %c0_87 = arith.constant 0 : index
    %128 = vector.load %arg6[%c0_86, %c0_87] : memref<1x128xf32, #tpu.memory_space<vmem>>, vector<1x128xf32>
    %129 = vector.broadcast %128 : vector<1x128xf32> to vector<16x128xf32>
    %130 = arith.addf %127, %129 : vector<16x128xf32>
    %131 = vector.shape_cast %130 : vector<16x128xf32> to vector<2x8x128xf32>
    %cst_88 = arith.constant 0.0654822737 : f32
    %132 = vector.broadcast %cst_88 : f32 to vector<2x8x128xf32>
    %133 = arith.mulf %132, %131 : vector<2x8x128xf32>
    %134 = arith.subf %116, %133 : vector<2x8x128xf32>
    %cst_89 = arith.constant 1.00434244 : f32
    %135 = vector.broadcast %cst_89 : f32 to vector<2x8x128xf32>
    %136 = arith.mulf %135, %134 : vector<2x8x128xf32>
    %c4_90 = arith.constant 4 : index
    %c0_91 = arith.constant 0 : index
    %c0_92 = arith.constant 0 : index
    %c0_93 = arith.constant 0 : index
    %137 = vector.load %arg2[%c4_90, %c0_91, %c0_92, %c0_93] : memref<8x2x8x128xf32, #tpu.memory_space<vmem>>, vector<1x2x8x128xf32>
    %138 = vector.shape_cast %137 : vector<1x2x8x128xf32> to vector<2x8x128xf32>
    %cst_94 = arith.constant 0.0928901061 : f32
    %139 = vector.broadcast %cst_94 : f32 to vector<2x8x128xf32>
    %140 = arith.mulf %139, %138 : vector<2x8x128xf32>
    %141 = arith.addf %136, %140 : vector<2x8x128xf32>
    %142 = vector.shape_cast %1 : vector<2x1x128xf32> to vector<2x1x128xf32>
    %143 = vector.broadcast %142 : vector<2x1x128xf32> to vector<2x8x128xf32>
    %144 = arith.select %4, %143, %141 : vector<2x8x128xi1>, vector<2x8x128xf32>
    %145 = vector.shape_cast %144 : vector<2x8x128xf32> to vector<16x128xf32>
    %c0_95 = arith.constant 0 : index
    %c0_96 = arith.constant 0 : index
    %146 = vector.load %arg3[%c0_95, %c0_96] : memref<128x128xf32, #tpu.memory_space<vmem>>, vector<128x128xf32>
    %cst_97 = arith.constant dense<0.000000e+00> : vector<16x128xf32>
    %147 = tpu.matmul %145, %146, %cst_97 {dimension_numbers = #tpu.dot_dimension_numbers<[1], [0], [0], [1], [0, 0, 1, 1], [], []>} : vector<16x128xf32>, vector<128x128xf32>, vector<16x128xf32> -> vector<16x128xf32>
    %c5 = arith.constant 5 : index
    %c0_98 = arith.constant 0 : index
    %c0_99 = arith.constant 0 : index
    %148 = vector.load %arg4[%c5, %c0_98, %c0_99] : memref<8x1x128xf32, #tpu.memory_space<vmem>>, vector<1x1x128xf32>
    %149 = vector.shape_cast %148 : vector<1x1x128xf32> to vector<1x128xf32>
    %150 = vector.broadcast %149 : vector<1x128xf32> to vector<16x128xf32>
    %151 = arith.addf %147, %150 : vector<16x128xf32>
    %cst_100 = arith.constant 0.000000e+00 : f32
    %152 = vector.broadcast %cst_100 : f32 to vector<16x128xf32>
    %153 = arith.maximumf %151, %152 : vector<16x128xf32>
    %c0_101 = arith.constant 0 : index
    %c0_102 = arith.constant 0 : index
    %154 = vector.load %arg5[%c0_101, %c0_102] : memref<128x128xf32, #tpu.memory_space<vmem>>, vector<128x128xf32>
    %cst_103 = arith.constant dense<0.000000e+00> : vector<16x128xf32>
    %155 = tpu.matmul %153, %154, %cst_103 {dimension_numbers = #tpu.dot_dimension_numbers<[1], [0], [0], [1], [0, 0, 1, 1], [], []>} : vector<16x128xf32>, vector<128x128xf32>, vector<16x128xf32> -> vector<16x128xf32>
    %c0_104 = arith.constant 0 : index
    %c0_105 = arith.constant 0 : index
    %156 = vector.load %arg6[%c0_104, %c0_105] : memref<1x128xf32, #tpu.memory_space<vmem>>, vector<1x128xf32>
    %157 = vector.broadcast %156 : vector<1x128xf32> to vector<16x128xf32>
    %158 = arith.addf %155, %157 : vector<16x128xf32>
    %159 = vector.shape_cast %158 : vector<16x128xf32> to vector<2x8x128xf32>
    %cst_106 = arith.constant 0.0616385527 : f32
    %160 = vector.broadcast %cst_106 : f32 to vector<2x8x128xf32>
    %161 = arith.mulf %160, %159 : vector<2x8x128xf32>
    %162 = arith.subf %144, %161 : vector<2x8x128xf32>
    %cst_107 = arith.constant 1.00290549 : f32
    %163 = vector.broadcast %cst_107 : f32 to vector<2x8x128xf32>
    %164 = arith.mulf %163, %162 : vector<2x8x128xf32>
    %c5_108 = arith.constant 5 : index
    %c0_109 = arith.constant 0 : index
    %c0_110 = arith.constant 0 : index
    %c0_111 = arith.constant 0 : index
    %165 = vector.load %arg2[%c5_108, %c0_109, %c0_110, %c0_111] : memref<8x2x8x128xf32, #tpu.memory_space<vmem>>, vector<1x2x8x128xf32>
    %166 = vector.shape_cast %165 : vector<1x2x8x128xf32> to vector<2x8x128xf32>
    %cst_112 = arith.constant 0.0760638863 : f32
    %167 = vector.broadcast %cst_112 : f32 to vector<2x8x128xf32>
    %168 = arith.mulf %167, %166 : vector<2x8x128xf32>
    %169 = arith.addf %164, %168 : vector<2x8x128xf32>
    %170 = vector.shape_cast %1 : vector<2x1x128xf32> to vector<2x1x128xf32>
    %171 = vector.broadcast %170 : vector<2x1x128xf32> to vector<2x8x128xf32>
    %172 = arith.select %4, %171, %169 : vector<2x8x128xi1>, vector<2x8x128xf32>
    %173 = vector.shape_cast %172 : vector<2x8x128xf32> to vector<16x128xf32>
    %c0_113 = arith.constant 0 : index
    %c0_114 = arith.constant 0 : index
    %174 = vector.load %arg3[%c0_113, %c0_114] : memref<128x128xf32, #tpu.memory_space<vmem>>, vector<128x128xf32>
    %cst_115 = arith.constant dense<0.000000e+00> : vector<16x128xf32>
    %175 = tpu.matmul %173, %174, %cst_115 {dimension_numbers = #tpu.dot_dimension_numbers<[1], [0], [0], [1], [0, 0, 1, 1], [], []>} : vector<16x128xf32>, vector<128x128xf32>, vector<16x128xf32> -> vector<16x128xf32>
    %c6 = arith.constant 6 : index
    %c0_116 = arith.constant 0 : index
    %c0_117 = arith.constant 0 : index
    %176 = vector.load %arg4[%c6, %c0_116, %c0_117] : memref<8x1x128xf32, #tpu.memory_space<vmem>>, vector<1x1x128xf32>
    %177 = vector.shape_cast %176 : vector<1x1x128xf32> to vector<1x128xf32>
    %178 = vector.broadcast %177 : vector<1x128xf32> to vector<16x128xf32>
    %179 = arith.addf %175, %178 : vector<16x128xf32>
    %cst_118 = arith.constant 0.000000e+00 : f32
    %180 = vector.broadcast %cst_118 : f32 to vector<16x128xf32>
    %181 = arith.maximumf %179, %180 : vector<16x128xf32>
    %c0_119 = arith.constant 0 : index
    %c0_120 = arith.constant 0 : index
    %182 = vector.load %arg5[%c0_119, %c0_120] : memref<128x128xf32, #tpu.memory_space<vmem>>, vector<128x128xf32>
    %cst_121 = arith.constant dense<0.000000e+00> : vector<16x128xf32>
    %183 = tpu.matmul %181, %182, %cst_121 {dimension_numbers = #tpu.dot_dimension_numbers<[1], [0], [0], [1], [0, 0, 1, 1], [], []>} : vector<16x128xf32>, vector<128x128xf32>, vector<16x128xf32> -> vector<16x128xf32>
    %c0_122 = arith.constant 0 : index
    %c0_123 = arith.constant 0 : index
    %184 = vector.load %arg6[%c0_122, %c0_123] : memref<1x128xf32, #tpu.memory_space<vmem>>, vector<1x128xf32>
    %185 = vector.broadcast %184 : vector<1x128xf32> to vector<16x128xf32>
    %186 = arith.addf %183, %185 : vector<16x128xf32>
    %187 = vector.shape_cast %186 : vector<16x128xf32> to vector<2x8x128xf32>
    %cst_124 = arith.constant 0.0533518381 : f32
    %188 = vector.broadcast %cst_124 : f32 to vector<2x8x128xf32>
    %189 = arith.mulf %188, %187 : vector<2x8x128xf32>
    %190 = arith.subf %172, %189 : vector<2x8x128xf32>
    %cst_125 = arith.constant 1.00147474 : f32
    %191 = vector.broadcast %cst_125 : f32 to vector<2x8x128xf32>
    %192 = arith.mulf %191, %190 : vector<2x8x128xf32>
    %c6_126 = arith.constant 6 : index
    %c0_127 = arith.constant 0 : index
    %c0_128 = arith.constant 0 : index
    %c0_129 = arith.constant 0 : index
    %193 = vector.load %arg2[%c6_126, %c0_127, %c0_128, %c0_129] : memref<8x2x8x128xf32, #tpu.memory_space<vmem>>, vector<1x2x8x128xf32>
    %194 = vector.shape_cast %193 : vector<1x2x8x128xf32> to vector<2x8x128xf32>
    %cst_130 = arith.constant 0.0542481057 : f32
    %195 = vector.broadcast %cst_130 : f32 to vector<2x8x128xf32>
    %196 = arith.mulf %195, %194 : vector<2x8x128xf32>
    %197 = arith.addf %192, %196 : vector<2x8x128xf32>
    %198 = vector.shape_cast %1 : vector<2x1x128xf32> to vector<2x1x128xf32>
    %199 = vector.broadcast %198 : vector<2x1x128xf32> to vector<2x8x128xf32>
    %200 = arith.select %4, %199, %197 : vector<2x8x128xi1>, vector<2x8x128xf32>
    %201 = vector.shape_cast %200 : vector<2x8x128xf32> to vector<16x128xf32>
    %c0_131 = arith.constant 0 : index
    %c0_132 = arith.constant 0 : index
    %202 = vector.load %arg3[%c0_131, %c0_132] : memref<128x128xf32, #tpu.memory_space<vmem>>, vector<128x128xf32>
    %cst_133 = arith.constant dense<0.000000e+00> : vector<16x128xf32>
    %203 = tpu.matmul %201, %202, %cst_133 {dimension_numbers = #tpu.dot_dimension_numbers<[1], [0], [0], [1], [0, 0, 1, 1], [], []>} : vector<16x128xf32>, vector<128x128xf32>, vector<16x128xf32> -> vector<16x128xf32>
    %c7 = arith.constant 7 : index
    %c0_134 = arith.constant 0 : index
    %c0_135 = arith.constant 0 : index
    %204 = vector.load %arg4[%c7, %c0_134, %c0_135] : memref<8x1x128xf32, #tpu.memory_space<vmem>>, vector<1x1x128xf32>
    %205 = vector.shape_cast %204 : vector<1x1x128xf32> to vector<1x128xf32>
    %206 = vector.broadcast %205 : vector<1x128xf32> to vector<16x128xf32>
    %207 = arith.addf %203, %206 : vector<16x128xf32>
    %cst_136 = arith.constant 0.000000e+00 : f32
    %208 = vector.broadcast %cst_136 : f32 to vector<16x128xf32>
    %209 = arith.maximumf %207, %208 : vector<16x128xf32>
    %c0_137 = arith.constant 0 : index
    %c0_138 = arith.constant 0 : index
    %210 = vector.load %arg5[%c0_137, %c0_138] : memref<128x128xf32, #tpu.memory_space<vmem>>, vector<128x128xf32>
    %cst_139 = arith.constant dense<0.000000e+00> : vector<16x128xf32>
    %211 = tpu.matmul %209, %210, %cst_139 {dimension_numbers = #tpu.dot_dimension_numbers<[1], [0], [0], [1], [0, 0, 1, 1], [], []>} : vector<16x128xf32>, vector<128x128xf32>, vector<16x128xf32> -> vector<16x128xf32>
    %c0_140 = arith.constant 0 : index
    %c0_141 = arith.constant 0 : index
    %212 = vector.load %arg6[%c0_140, %c0_141] : memref<1x128xf32, #tpu.memory_space<vmem>>, vector<1x128xf32>
    %213 = vector.broadcast %212 : vector<1x128xf32> to vector<16x128xf32>
    %214 = arith.addf %211, %213 : vector<16x128xf32>
    %215 = vector.shape_cast %214 : vector<16x128xf32> to vector<2x8x128xf32>
    %cst_142 = arith.constant 0.00999999977 : f32
    %216 = vector.broadcast %cst_142 : f32 to vector<2x8x128xf32>
    %217 = arith.mulf %216, %215 : vector<2x8x128xf32>
    %218 = arith.subf %200, %217 : vector<2x8x128xf32>
    %cst_143 = arith.constant 1.000050e+00 : f32
    %219 = vector.broadcast %cst_143 : f32 to vector<2x8x128xf32>
    %220 = arith.mulf %219, %218 : vector<2x8x128xf32>
    %c7_144 = arith.constant 7 : index
    %c0_145 = arith.constant 0 : index
    %c0_146 = arith.constant 0 : index
    %c0_147 = arith.constant 0 : index
    %221 = vector.load %arg2[%c7_144, %c0_145, %c0_146, %c0_147] : memref<8x2x8x128xf32, #tpu.memory_space<vmem>>, vector<1x2x8x128xf32>
    %222 = vector.shape_cast %221 : vector<1x2x8x128xf32> to vector<2x8x128xf32>
    %cst_148 = arith.constant 0.000000e+00 : f32
    %223 = vector.broadcast %cst_148 : f32 to vector<2x8x128xf32>
    %224 = arith.mulf %223, %222 : vector<2x8x128xf32>
    %225 = arith.addf %220, %224 : vector<2x8x128xf32>
    %226 = vector.shape_cast %1 : vector<2x1x128xf32> to vector<2x1x128xf32>
    %227 = vector.broadcast %226 : vector<2x1x128xf32> to vector<2x8x128xf32>
    %228 = arith.select %4, %227, %225 : vector<2x8x128xi1>, vector<2x8x128xf32>
    %c0_149 = arith.constant 0 : index
    %c0_150 = arith.constant 0 : index
    %c0_151 = arith.constant 0 : index
    %229 = vector.load %arg7[%c0_149, %c0_150, %c0_151] : memref<2x8x128xf32, #tpu.memory_space<vmem>>, vector<2x8x128xf32>
    tpu.vector_store %arg7[%c0_149, %c0_150, %c0_151], %228 {strides = array<i32>} : memref<2x8x128xf32, #tpu.memory_space<vmem>>, vector<2x8x128xf32>,
    return
  }
}

</mosaic_0001>

<bundles_post_ra>
// kernel: tpu_custom_call.1
= control target key start
LH: loop header
LB: loop body
LE: loop exit
PB: predicated region body
PF: predicated region fallthrough
CT: control target
= control target key end

     0   :  { %12 = vsyncpa [#allocation3], 0  ;;  %s3633_s0 = inlined_call_operand.hbm [shape: f32[2,1,128], index: 0, kind: input, shape index: {}]   ;;  %s3634_s1 = inlined_call_operand.hbm [shape: f32[2,8,128], index: 1, kind: input, shape index: {}]   ;;  %s3635_s2 = inlined_call_operand.hbm [shape: f32[8,2,8,128], index: 2, kind: input, shape index: {}]   ;;  %s3636_s3 = inlined_call_operand.hbm [shape: f32[128,128], index: 3, kind: input, shape index: {}]   ;;  %s3637_s4 = inlined_call_operand.vmem [shape: f32[8,1,128], index: 4, kind: input, shape index: {}]   ;;  %s3638_s5 = inlined_call_operand.hbm [shape: f32[128,128], index: 5, kind: input, shape index: {}]   ;;  %s3639_s6 = inlined_call_operand.vmem [shape: f32[1,128], index: 6, kind: input, shape index: {}]   ;;  %s3640_s7 = inlined_call_operand.hbm [shape: f32[2,8,128], index: 7, kind: output, shape index: {}]  }
   0x1   :  { %13 = vsyncpa [#allocation6], 0 }
   0x2   :  { %14 = vsyncpa [#allocation9], 0 }
   0x3   :  { %15 = vsyncpa [#allocation4], 0  ;;  %s3100_s24 = smov [#allocation5]   ;;  %s2960_s28 = scalar_lea.hbm %s3634_s1, 256 }
   0x4   :  { %s33_s25 = sshll.u32 %s3100_s24, 4  ;;  %p2961_p0 = scmp.ne.s32.totalorder %s3634_s1, %s2960_s28  ;;  %s34_s25 = int_to_ptr.vmem [resolvable:$true] %s33_s25 }
   0x5   :  { %p2964_p1 = scmp.lt.u32.totalorder %s2960_s28, %s3634_s1 }
   0x7   :  { %p2966_p2 = pnand %p2964_p1, %p2961_p0 }
   0x9   :  { %2969 = shalt.err (!%p2966_p2)
}
   0xa   :  { %s2970_s10 = scalar_lea.vmem %s34_s25, 256  ;;  %p2975_p4 = scmp.lt.s32.totalorder %s34_s25, %s34_s25 }
   0xb   :  { %p2971_p3 = scmp.ne.s32.totalorder %s34_s25, %s2970_s10  ;;  %p2976_p5 = scmp.lt.s32.totalorder %s2970_s10, %s2970_s10 }
   0xd   :  { %p2977_p6 = por %p2976_p5, %p2975_p4 }
   0xf   :  { %p2978_p7 = pnand %p2977_p6, %p2971_p3 }
  0x11   :  { %2981 = shalt.err (!%p2978_p7)
}
  0x12   :  { %s3101_s11 = smov 128   ;;  %s3102_s12 = smov 8  }
  0x13   :  { %39 = dma.hbm_to_vmem [thread:$0]  %s3634_s1, 256, %s34_s25, [#allocation6], %s3101_s11, %s3101_s11, %s3102_s12  }
  0x14   :  { %s3103_s15 = smov [#allocation8]   ;;  %s3104_s17 = smov [#allocation2]  }
  0x15   :  { %s57_s16 = sshll.u32 %s3103_s15, 4  ;;  %s21_s18 = sshll.u32 %s3104_s17, 4  ;;  %s58_s16 = int_to_ptr.vmem [resolvable:$true] %s57_s16  ;;  %s22_s18 = int_to_ptr.vmem [resolvable:$true] %s21_s18 }
  0x16   :  { %s2982_s21 = scalar_lea.hbm %s3636_s3, 2048 }
  0x17   :  { %p2983_p8 = scmp.ne.s32.totalorder %s3636_s3, %s2982_s21  ;;  %p2986_p9 = scmp.lt.u32.totalorder %s2982_s21, %s3636_s3 }
  0x19   :  { %p2988_p10 = pnand %p2986_p9, %p2983_p8 }
  0x1b   :  { %2991 = shalt.err (!%p2988_p10)
}
  0x1c   :  { %s2992_s1 = scalar_lea.vmem %s58_s16, 2048  ;;  %p2997_p12 = scmp.lt.s32.totalorder %s58_s16, %s58_s16 }
  0x1d   :  { %p2993_p11 = scmp.ne.s32.totalorder %s58_s16, %s2992_s1  ;;  %p2998_p13 = scmp.lt.s32.totalorder %s2992_s1, %s2992_s1 }
  0x1f   :  { %p2999_p0 = por %p2998_p13, %p2997_p12 }
  0x21   :  { %p3000_p1 = pnand %p2999_p0, %p2993_p11 }
  0x23   :  { %3003 = shalt.err (!%p3000_p1)
}
  0x24   :  { %63 = dma.hbm_to_vmem [thread:$0]  %s3636_s3, 2048, %s58_s16, [#allocation9], %s3101_s11, %s3101_s11, %s3102_s12  }
  0x25   :  { %s3004_s30 = scalar_lea.hbm %s3633_s0, 32 }
  0x26   :  { %p3005_p2 = scmp.ne.s32.totalorder %s3633_s0, %s3004_s30  ;;  %p3008_p3 = scmp.lt.u32.totalorder %s3004_s30, %s3633_s0 }
  0x28   :  { %p3010_p4 = pnand %p3008_p3, %p3005_p2 }
  0x2a   :  { %3013 = shalt.err (!%p3010_p4)
}
  0x2b   :  { %s3014_s14 = scalar_lea.vmem %s22_s18, 32  ;;  %p3019_p6 = scmp.lt.s32.totalorder %s22_s18, %s22_s18 }
  0x2c   :  { %p3015_p5 = scmp.ne.s32.totalorder %s22_s18, %s3014_s14  ;;  %p3020_p7 = scmp.lt.s32.totalorder %s3014_s14, %s3014_s14 }
  0x2e   :  { %p3021_p8 = por %p3020_p7, %p3019_p6 }
  0x30   :  { %p3022_p9 = pnand %p3021_p8, %p3015_p5 }
  0x32   :  { %3025 = shalt.err (!%p3022_p9)
}
  0x33   :  { %s3105_s3 = smov 16   ;;  %s3106_s15 = smov 1  }
  0x34   :  { %27 = dma.hbm_to_vmem [thread:$0]  %s3633_s0, 32, %s22_s18, [#allocation3], %s3105_s3, %s3105_s3, %s3106_s15  }
  0x35   :  { %s3107_s19 = smov [#allocation7]   ;;  %s3108_s21 = smov [#allocation10]  }
  0x36   :  { %s45_s20 = sshll.u32 %s3107_s19, 4  ;;  %s71_s22 = sshll.u32 %s3108_s21, 4  ;;  %s46_s20 = int_to_ptr.vmem [resolvable:$true] %s45_s20  ;;  %s72_s22 = int_to_ptr.vmem [resolvable:$true] %s71_s22 }
  0x37   :  { %s3026_s26 = scalar_lea.hbm %s3635_s2, 2048 }
  0x38   :  { %p3027_p10 = scmp.ne.s32.totalorder %s3635_s2, %s3026_s26  ;;  %p3030_p11 = scmp.lt.u32.totalorder %s3026_s26, %s3635_s2 }
  0x3a   :  { %p3032_p12 = pnand %p3030_p11, %p3027_p10 }
  0x3c   :  { %3035 = shalt.err (!%p3032_p12)
}
  0x3d   :  { %s3036_s0 = scalar_lea.vmem %s46_s20, 2048  ;;  %p3041_p0 = scmp.lt.s32.totalorder %s46_s20, %s46_s20 }
  0x3e   :  { %p3037_p13 = scmp.ne.s32.totalorder %s46_s20, %s3036_s0  ;;  %p3042_p1 = scmp.lt.s32.totalorder %s3036_s0, %s3036_s0 }
  0x40   :  { %p3043_p2 = por %p3042_p1, %p3041_p0 }
  0x42   :  { %p3044_p3 = pnand %p3043_p2, %p3037_p13 }
  0x44   :  { %3047 = shalt.err (!%p3044_p3)
}
  0x45   :  { %51 = dma.hbm_to_vmem [thread:$0]  %s3635_s2, 2048, %s46_s20, [#allocation6], %s3101_s11, %s3101_s11, %s3102_s12  }
  0x46   :  { %s3048_s9 = scalar_lea.hbm %s3638_s5, 2048 }
  0x47   :  { %p3049_p4 = scmp.ne.s32.totalorder %s3638_s5, %s3048_s9  ;;  %p3052_p5 = scmp.lt.u32.totalorder %s3048_s9, %s3638_s5 }
  0x49   :  { %p3054_p6 = pnand %p3052_p5, %p3049_p4 }
  0x4b   :  { %3057 = shalt.err (!%p3054_p6)
}
  0x4c   :  { %s3058_s15 = scalar_lea.vmem %s72_s22, 2048  ;;  %p3063_p8 = scmp.lt.s32.totalorder %s72_s22, %s72_s22 }
  0x4d   :  { %p3059_p7 = scmp.ne.s32.totalorder %s72_s22, %s3058_s15  ;;  %p3064_p9 = scmp.lt.s32.totalorder %s3058_s15, %s3058_s15 }
  0x4f   :  { %p3065_p10 = por %p3064_p9, %p3063_p8 }
  0x51   :  { %p3066_p11 = pnand %p3065_p10, %p3059_p7 }
  0x53   :  { %3069 = shalt.err (!%p3066_p11)
}
  0x54   :  { %77 = dma.hbm_to_vmem [thread:$0]  %s3638_s5, 2048, %s72_s22, [#allocation9], %s3101_s11, %s3101_s11, %s3102_s12  }
  0x55   :  { %3092 = dma.done.wait [#allocation3], 32  }
  0x56   :  { %3093 = vsyncadd [#allocation3], 4294967264 }
  0x57   :  { %3094 = dma.done.wait [#allocation6], 2304  }
  0x58   :  { %3095 = vsyncadd [#allocation6], 4294964992 }
  0x59   :  { %3096 = dma.done.wait [#allocation9], 4096  }
  0x5a   :  { %3097 = vsyncadd [#allocation9], 4294963200  ;;  %v102_v0 = vld [vmem:[#allocation8] sm:$0xff]  ;;  %v103_v1 = vld [vmem:[#allocation8 + $0x8] sm:$0xff]  ;;  %v99_v61 = vlaneseq }
  0x5b   :  { %v104_v2 = vld [vmem:[#allocation8 + $0x10] sm:$0xff]  ;;  %v3222_v3 = vpack.c.bf16 %v103_v1, %v102_v0  ;;  %v105_v4 = vld [vmem:[#allocation8 + $0x18] sm:$0xff]  ;;  %v106_v6 = vld [vmem:[#allocation8 + $0x20] sm:$0xff] }
  0x5c   :  { %v3224_v5 = vpack.c.bf16 %v105_v4, %v104_v2  ;;  %v107_v7 = vld [vmem:[#allocation8 + $0x28] sm:$0xff]  ;;  %v108_v9 = vld [vmem:[#allocation8 + $0x30] sm:$0xff]  ;;  %v109_v10 = vld [vmem:[#allocation8 + $0x38] sm:$0xff] }
  0x5d   :  { %2439 = vmatprep.subr.bf16.mxu0 %v3222_v3  ;;  %v3229_v8 = vpack.c.bf16 %v107_v7, %v106_v6  ;;  %v3231_v11 = vld [vmem:[#allocation5] sm:$0xff]  ;;  %v202_v12 = vld [vmem:[#allocation10] sm:$0xff]  ;;  %v203_v13 = vld [vmem:[#allocation10 + $0x8] sm:$0xff]  ;;  %v3240_v20 = vpack.c.bf16 %v109_v10, %v108_v9  ;;  %v3337_v7 = vshrl.u32 %v99_v61, 7 }
  0x5e   :  { %2441 = vmatpush3.bf16.msra.mxu0 %v3222_v3  ;;  %1910 = vmatprep.mubr.f32.mxu0 %v3231_v11  ;;  %v204_v14 = vld [vmem:[#allocation10 + $0x10] sm:$0xff]  ;;  %v3234_v15 = vpack.c.bf16 %v203_v13, %v202_v12  ;;  %v205_v16 = vld [vmem:[#allocation10 + $0x18] sm:$0xff]  ;;  %v206_v18 = vld [vmem:[#allocation10 + $0x20] sm:$0xff] }
  0x5f   :  { %2443 = vmatprep.subr.bf16.mxu0 %v3224_v5  ;;  %v3237_v17 = vpack.c.bf16 %v205_v16, %v204_v14  ;;  %v207_v19 = vld [vmem:[#allocation10 + $0x28] sm:$0xff]  ;;  %v110_v21 = vld [vmem:[#allocation8 + $0x40] sm:$0xff]  ;;  %v208_v24 = vld [vmem:[#allocation10 + $0x30] sm:$0xff]  ;;  %vm101_vm0 = vcmp.eq.s32.totalorder %v3337_v7, 0 }
  0x60   :  { %2471 = vmatprep.subr.bf16.mxu1 %v3234_v15  ;;  %v111_v22 = vld [vmem:[#allocation8 + $0x48] sm:$0xff]  ;;  %v3245_v23 = vpack.c.bf16 %v207_v19, %v206_v18  ;;  %v209_v25 = vld [vmem:[#allocation10 + $0x38] sm:$0xff]  ;;  %v112_v27 = vld [vmem:[#allocation8 + $0x50] sm:$0xff] }
  0x61   :  { %2473 = vmatpush3.bf16.msra.mxu1 %v3234_v15  ;;  %v3249_v26 = vpack.c.bf16 %v111_v22, %v110_v21  ;;  %v113_v28 = vld [vmem:[#allocation8 + $0x58] sm:$0xff]  ;;  %v3253_v29 = vpack.c.bf16 %v209_v25, %v208_v24  ;;  %v210_v30 = vld [vmem:[#allocation10 + $0x40] sm:$0xff]  ;;  %v211_v31 = vld [vmem:[#allocation10 + $0x48] sm:$0xff] }
  0x62   :  { %2445 = vmatpush3.bf16.msra.mxu0 %v3224_v5  ;;  %2475 = vmatprep.subr.bf16.mxu1 %v3237_v17  ;;  %v3257_v32 = vpack.c.bf16 %v113_v28, %v112_v27  ;;  %v114_v33 = vld [vmem:[#allocation8 + $0x60] sm:$0xff]  ;;  %v115_v34 = vld [vmem:[#allocation8 + $0x68] sm:$0xff]  ;;  %v3261_v35 = vpack.c.bf16 %v211_v31, %v210_v30  ;;  %v212_v36 = vld [vmem:[#allocation10 + $0x50] sm:$0xff] }
  0x63   :  { %2447 = vmatprep.subr.bf16.mxu0 %v3229_v8  ;;  %v213_v37 = vld [vmem:[#allocation10 + $0x58] sm:$0xff]  ;;  %v3265_v38 = vpack.c.bf16 %v115_v34, %v114_v33  ;;  %v116_v39 = vld [vmem:[#allocation8 + $0x70] sm:$0xff]  ;;  %v214_v42 = vld [vmem:[#allocation10 + $0x60] sm:$0xff] }
  0x64   :  { %v117_v40 = vld [vmem:[#allocation8 + $0x78] sm:$0xff]  ;;  %v3269_v41 = vpack.c.bf16 %v213_v37, %v212_v36  ;;  %v215_v43 = vld [vmem:[#allocation10 + $0x68] sm:$0xff]  ;;  %v216_v47 = vld [vmem:[#allocation10 + $0x70] sm:$0xff] }
  0x65   :  { %2477 = vmatpush3.bf16.msra.mxu1 %v3237_v17  ;;  %v3273_v44 = vpack.c.bf16 %v117_v40, %v116_v39  ;;  %v3277_v45 = vpack.c.bf16 %v215_v43, %v214_v42  ;;  %v3284_v46 = vld [vmem:[#allocation5 + $0x8] sm:$0xff]  ;;  %v1572_v50 = vld [vmem:[%s3637_s4] ss:$0 sm:$0xff]  ;;  %v307_v62 = vld [vmem:[#allocation7 + $0x8] sm:$0xff] }
  0x66   :  { %2449 = vmatpush3.bf16.msra.mxu0 %v3229_v8  ;;  %2479 = vmatprep.subr.bf16.mxu1 %v3245_v23  ;;  %v217_v48 = vld [vmem:[#allocation10 + $0x78] sm:$0xff]  ;;  %v3332_v57 = vld [vmem:[%s3639_s6] ss:$0 sm:$0xff]  ;;  %v309_v6 = vmul.f32 0.14142136, %v307_v62  ;;  %v493_v42 = vld [vmem:[#allocation7 + $0x10] sm:$0xff] }
  0x67   :  { %2451 = vmatprep.subr.bf16.mxu0 %v3240_v20  ;;  %v3305_v49 = vpack.c.bf16 %v217_v48, %v216_v47  ;;  %v306_v1 = vld [vmem:[#allocation7] sm:$0xff]  ;;  %v3340_v16 = vld [vmem:[#allocation2] ss:$0 sm:$0xff]  ;;  %v3343_v19 = vld [vmem:[#allocation2 + $0x1] ss:$0 sm:$0xff] }
  0x68   :  { %v308_v10 = vmul.f32 0.14142136, %v306_v1  ;;  %v1577_v22 = vld [vmem:[%s3637_s4 + $0x1] ss:$0 sm:$0xff]  ;;  %v494_v37 = vld [vmem:[#allocation7 + $0x18] sm:$0xff] }
  0x69   :  { %2481 = vmatpush3.bf16.msra.mxu1 %v3245_v23  ;;  %v496_v47 = vmul.f32 0.13098527, %v494_v37 }
  0x6a   :  { %2453 = vmatpush3.bf16.msra.mxu0 %v3240_v20  ;;  %2483 = vmatprep.subr.bf16.mxu1 %v3253_v29 }
  0x6b   :  { %2455 = vmatprep.subr.bf16.mxu0 %v3249_v26 }
  0x6d   :  { %2485 = vmatpush3.bf16.msra.mxu1 %v3253_v29 }
  0x6e   :  { %2457 = vmatpush3.bf16.msra.mxu0 %v3249_v26  ;;  %2487 = vmatprep.subr.bf16.mxu1 %v3261_v35 }
  0x6f   :  { %2459 = vmatprep.subr.bf16.mxu0 %v3257_v32 }
  0x71   :  { %2489 = vmatpush3.bf16.msra.mxu1 %v3261_v35 }
  0x72   :  { %2461 = vmatpush3.bf16.msra.mxu0 %v3257_v32  ;;  %2491 = vmatprep.subr.bf16.mxu1 %v3269_v41 }
  0x73   :  { %2463 = vmatprep.subr.bf16.mxu0 %v3265_v38 }
  0x75   :  { %2493 = vmatpush3.bf16.msra.mxu1 %v3269_v41 }
  0x76   :  { %2465 = vmatpush3.bf16.msra.mxu0 %v3265_v38  ;;  %2495 = vmatprep.subr.bf16.mxu1 %v3277_v45 }
  0x77   :  { %2467 = vmatprep.subr.bf16.mxu0 %v3273_v44 }
  0x79   :  { %2497 = vmatpush3.bf16.msra.mxu1 %v3277_v45 }
  0x7a   :  { %2469 = vmatpush3.bf16.msra.mxu0 %v3273_v44  ;;  %2499 = vmatprep.subr.bf16.mxu1 %v3305_v49 }
  0x7b   :  { %2503 = vmatprep.subr.bf16.mxu0 %v3222_v3 }
  0x7d   :  { %1911 = vmatmul.mubr.f32.vlgmr.msra.gmra.mrb[0].mxu0 %v3284_v46  ;;  %2501 = vmatpush3.bf16.msra.mxu1 %v3305_v49 }
  0x7e   :  { %2505 = vmatpush3.bf16.msra.mxu0 %v3222_v3  ;;  %2535 = vmatprep.subr.bf16.mxu1 %v3234_v15 }
  0x7f   :  { %2507 = vmatprep.subr.bf16.mxu0 %v3224_v5 }
  0x82   :  { %2509 = vmatpush3.bf16.msra.mxu0 %v3224_v5 }
  0x83   :  { %2511 = vmatprep.subr.bf16.mxu0 %v3229_v8 }
  0x86   :  { %2513 = vmatpush3.bf16.msra.mxu0 %v3229_v8 }
  0x87   :  { %2515 = vmatprep.subr.bf16.mxu0 %v3240_v20 }
  0x8a   :  { %2517 = vmatpush3.bf16.msra.mxu0 %v3240_v20 }
  0x8b   :  { %2519 = vmatprep.subr.bf16.mxu0 %v3249_v26 }
  0x8e   :  { %2521 = vmatpush3.bf16.msra.mxu0 %v3249_v26 }
  0x8f   :  { %2523 = vmatprep.subr.bf16.mxu0 %v3257_v32 }
  0x92   :  { %2525 = vmatpush3.bf16.msra.mxu0 %v3257_v32 }
  0x93   :  { %2527 = vmatprep.subr.bf16.mxu0 %v3265_v38 }
  0x96   :  { %2529 = vmatpush3.bf16.msra.mxu0 %v3265_v38 }
  0x97   :  { %2531 = vmatprep.subr.bf16.mxu0 %v3273_v44 }
  0x9a   :  { %2533 = vmatpush3.bf16.msra.mxu0 %v3273_v44 }
  0x9b   :  { %2567 = vmatprep.subr.bf16.mxu0 %v3222_v3 }
 0x150   :  { %v1912_v51 = vpop.f32.mrb[0].mxu0 }
 0x151   :  { %v197_v52 = vadd.f32 %v1912_v51, %v1572_v50  ;;  %v191_v53 = vpop.f32.mrb[1].mxu0 }
 0x152   :  { %v192_v54 = vadd.f32 %v1572_v50, %v191_v53  ;;  %v495_v50 = vmul.f32 0.13098527, %v493_v42 }
 0x153   :  { %v201_v56 = vmax.f32 %v197_v52, 0.0 }
 0x154   :  { %v200_v55 = vmax.f32 %v192_v54, 0.0 }
 0x156   :  { %1945 = vmatprep.mubr.f32.mxu1 %v200_v55 }
 0x157   :  { %1946 = vmatmul.mubr.f32.vlgmr.msra.gmra.mrb[0].mxu1 %v201_v56 }
 0x158   :  { %2537 = vmatpush3.bf16.msra.mxu1 %v3234_v15 }
 0x159   :  { %2539 = vmatprep.subr.bf16.mxu1 %v3237_v17 }
 0x15c   :  { %2541 = vmatpush3.bf16.msra.mxu1 %v3237_v17 }
 0x15d   :  { %2543 = vmatprep.subr.bf16.mxu1 %v3245_v23 }
 0x160   :  { %2545 = vmatpush3.bf16.msra.mxu1 %v3245_v23 }
 0x161   :  { %2547 = vmatprep.subr.bf16.mxu1 %v3253_v29 }
 0x164   :  { %2549 = vmatpush3.bf16.msra.mxu1 %v3253_v29 }
 0x165   :  { %2551 = vmatprep.subr.bf16.mxu1 %v3261_v35 }
 0x168   :  { %2553 = vmatpush3.bf16.msra.mxu1 %v3261_v35 }
 0x169   :  { %2555 = vmatprep.subr.bf16.mxu1 %v3269_v41 }
 0x16c   :  { %2557 = vmatpush3.bf16.msra.mxu1 %v3269_v41 }
 0x16d   :  { %2559 = vmatprep.subr.bf16.mxu1 %v3277_v45 }
 0x170   :  { %2561 = vmatpush3.bf16.msra.mxu1 %v3277_v45 }
 0x171   :  { %2563 = vmatprep.subr.bf16.mxu1 %v3305_v49 }
 0x174   :  { %2565 = vmatpush3.bf16.msra.mxu1 %v3305_v49 }
 0x175   :  { %2599 = vmatprep.subr.bf16.mxu1 %v3234_v15 }
 0x22a   :  { %v1947_v58 = vpop.f32.mrb[0].mxu1 }
 0x22b   :  { %v297_v59 = vadd.f32 %v1947_v58, %v3332_v57  ;;  %v291_v60 = vpop.f32.mrb[1].mxu1  ;;  %v1579_v58 = vld [vmem:[%s3637_s4 + $0x2] ss:$0 sm:$0xff] }
 0x22c   :  { %v292_v63 = vadd.f32 %v3332_v57, %v291_v60 }
 0x22d   :  { %v301_v0 = vmul.f32 0.0717091, %v297_v59 }
 0x22e   :  { %v300_v2 = vmul.f32 0.0717091, %v292_v63 }
 0x22f   :  { %v303_v4 = vsub.f32 %v3284_v46, %v301_v0 }
 0x230   :  { %v302_v9 = vsub.f32 %v3231_v11, %v300_v2 }
 0x231   :  { %v305_v12 = vmul.f32 1.0101526, %v303_v4 }
 0x232   :  { %v304_v13 = vmul.f32 1.0101526, %v302_v9 }
 0x233   :  { %v311_v14 = vadd.f32 %v309_v6, %v305_v12  ;;  %v669_v6 = vld [vmem:[#allocation7 + $0x28] sm:$0xff]  ;;  %v668_v12 = vld [vmem:[#allocation7 + $0x20] sm:$0xff] }
 0x234   :  { %v310_v18 = vadd.f32 %v308_v10, %v304_v13 }
 0x235   :  { %v325_v11 = vsel %vm101_vm0, %v3343_v19, %v311_v14 }
 0x236   :  { %v324_v21 = vsel %vm101_vm0, %v3340_v16, %v310_v18  ;;  %v671_v18 = vmul.f32 0.119642325, %v669_v6 }
 0x237   :  { %1980 = vmatprep.mubr.f32.mxu0 %v324_v21 }
 0x238   :  { %1981 = vmatmul.mubr.f32.vlgmr.msra.gmra.mrb[2].mxu0 %v325_v11 }
 0x239   :  { %2569 = vmatpush3.bf16.msra.mxu0 %v3222_v3 }
 0x23a   :  { %2571 = vmatprep.subr.bf16.mxu0 %v3224_v5 }
 0x23d   :  { %2573 = vmatpush3.bf16.msra.mxu0 %v3224_v5 }
 0x23e   :  { %2575 = vmatprep.subr.bf16.mxu0 %v3229_v8 }
 0x241   :  { %2577 = vmatpush3.bf16.msra.mxu0 %v3229_v8 }
 0x242   :  { %2579 = vmatprep.subr.bf16.mxu0 %v3240_v20 }
 0x245   :  { %2581 = vmatpush3.bf16.msra.mxu0 %v3240_v20 }
 0x246   :  { %2583 = vmatprep.subr.bf16.mxu0 %v3249_v26 }
 0x249   :  { %2585 = vmatpush3.bf16.msra.mxu0 %v3249_v26 }
 0x24a   :  { %2587 = vmatprep.subr.bf16.mxu0 %v3257_v32 }
 0x24d   :  { %2589 = vmatpush3.bf16.msra.mxu0 %v3257_v32 }
 0x24e   :  { %2591 = vmatprep.subr.bf16.mxu0 %v3265_v38 }
 0x251   :  { %2593 = vmatpush3.bf16.msra.mxu0 %v3265_v38 }
 0x252   :  { %2595 = vmatprep.subr.bf16.mxu0 %v3273_v44 }
 0x255   :  { %2597 = vmatpush3.bf16.msra.mxu0 %v3273_v44 }
 0x256   :  { %2631 = vmatprep.subr.bf16.mxu0 %v3222_v3 }
 0x30b   :  { %v1982_v24 = vpop.f32.mrb[2].mxu0 }
 0x30c   :  { %v406_v25 = vadd.f32 %v1982_v24, %v1577_v22  ;;  %v400_v27 = vpop.f32.mrb[3].mxu0 }
 0x30d   :  { %v401_v28 = vadd.f32 %v1577_v22, %v400_v27 }
 0x30e   :  { %v410_v31 = vmax.f32 %v406_v25, 0.0 }
 0x30f   :  { %v409_v30 = vmax.f32 %v401_v28, 0.0 }
 0x311   :  { %2015 = vmatprep.mubr.f32.mxu1 %v409_v30 }
 0x312   :  { %2016 = vmatmul.mubr.f32.vlgmr.msra.gmra.mrb[2].mxu1 %v410_v31  ;;  %v1581_v31 = vld [vmem:[%s3637_s4 + $0x3] ss:$0 sm:$0xff] }
 0x313   :  { %2601 = vmatpush3.bf16.msra.mxu1 %v3234_v15 }
 0x314   :  { %2603 = vmatprep.subr.bf16.mxu1 %v3237_v17 }
 0x317   :  { %2605 = vmatpush3.bf16.msra.mxu1 %v3237_v17 }
 0x318   :  { %2607 = vmatprep.subr.bf16.mxu1 %v3245_v23 }
 0x31b   :  { %2609 = vmatpush3.bf16.msra.mxu1 %v3245_v23 }
 0x31c   :  { %2611 = vmatprep.subr.bf16.mxu1 %v3253_v29 }
 0x31f   :  { %2613 = vmatpush3.bf16.msra.mxu1 %v3253_v29 }
 0x320   :  { %2615 = vmatprep.subr.bf16.mxu1 %v3261_v35 }
 0x323   :  { %2617 = vmatpush3.bf16.msra.mxu1 %v3261_v35 }
 0x324   :  { %2619 = vmatprep.subr.bf16.mxu1 %v3269_v41 }
 0x327   :  { %2621 = vmatpush3.bf16.msra.mxu1 %v3269_v41 }
 0x328   :  { %2623 = vmatprep.subr.bf16.mxu1 %v3277_v45 }
 0x32b   :  { %2625 = vmatpush3.bf16.msra.mxu1 %v3277_v45 }
 0x32c   :  { %2627 = vmatprep.subr.bf16.mxu1 %v3305_v49 }
 0x32f   :  { %2629 = vmatpush3.bf16.msra.mxu1 %v3305_v49 }
 0x330   :  { %2663 = vmatprep.subr.bf16.mxu1 %v3234_v15 }
 0x3e5   :  { %v2017_v33 = vpop.f32.mrb[2].mxu1 }
 0x3e6   :  { %v483_v34 = vadd.f32 %v2017_v33, %v3332_v57  ;;  %v477_v36 = vpop.f32.mrb[3].mxu1 }
 0x3e7   :  { %v478_v39 = vadd.f32 %v3332_v57, %v477_v36 }
 0x3e8   :  { %v487_v40 = vmul.f32 0.07065452, %v483_v34 }
 0x3e9   :  { %v486_v43 = vmul.f32 0.07065452, %v478_v39 }
 0x3ea   :  { %v489_v46 = vsub.f32 %v325_v11, %v487_v40  ;;  %v670_v11 = vmul.f32 0.119642325, %v668_v12 }
 0x3eb   :  { %v488_v48 = vsub.f32 %v324_v21, %v486_v43 }
 0x3ec   :  { %v491_v51 = vmul.f32 1.0086906, %v489_v46 }
 0x3ed   :  { %v490_v52 = vmul.f32 1.0086906, %v488_v48 }
 0x3ee   :  { %v498_v53 = vadd.f32 %v496_v47, %v491_v51  ;;  %v844_v47 = vld [vmem:[#allocation7 + $0x38] sm:$0xff]  ;;  %v843_v51 = vld [vmem:[#allocation7 + $0x30] sm:$0xff] }
 0x3ef   :  { %v497_v54 = vadd.f32 %v495_v50, %v490_v52 }
 0x3f0   :  { %v500_v56 = vsel %vm101_vm0, %v3343_v19, %v498_v53 }
 0x3f1   :  { %v499_v55 = vsel %vm101_vm0, %v3340_v16, %v497_v54  ;;  %v846_v54 = vmul.f32 0.107104756, %v844_v47 }
 0x3f2   :  { %2050 = vmatprep.mubr.f32.mxu0 %v499_v55 }
 0x3f3   :  { %2051 = vmatmul.mubr.f32.vlgmr.msra.gmra.mrb[4].mxu0 %v500_v56 }
 0x3f4   :  { %2633 = vmatpush3.bf16.msra.mxu0 %v3222_v3 }
 0x3f5   :  { %2635 = vmatprep.subr.bf16.mxu0 %v3224_v5 }
 0x3f8   :  { %2637 = vmatpush3.bf16.msra.mxu0 %v3224_v5 }
 0x3f9   :  { %2639 = vmatprep.subr.bf16.mxu0 %v3229_v8 }
 0x3fc   :  { %2641 = vmatpush3.bf16.msra.mxu0 %v3229_v8 }
 0x3fd   :  { %2643 = vmatprep.subr.bf16.mxu0 %v3240_v20 }
 0x400   :  { %2645 = vmatpush3.bf16.msra.mxu0 %v3240_v20 }
 0x401   :  { %2647 = vmatprep.subr.bf16.mxu0 %v3249_v26 }
 0x404   :  { %2649 = vmatpush3.bf16.msra.mxu0 %v3249_v26 }
 0x405   :  { %2651 = vmatprep.subr.bf16.mxu0 %v3257_v32 }
 0x408   :  { %2653 = vmatpush3.bf16.msra.mxu0 %v3257_v32 }
 0x409   :  { %2655 = vmatprep.subr.bf16.mxu0 %v3265_v38 }
 0x40c   :  { %2657 = vmatpush3.bf16.msra.mxu0 %v3265_v38 }
 0x40d   :  { %2659 = vmatprep.subr.bf16.mxu0 %v3273_v44 }
 0x410   :  { %2661 = vmatpush3.bf16.msra.mxu0 %v3273_v44 }
 0x411   :  { %2695 = vmatprep.subr.bf16.mxu0 %v3222_v3 }
 0x4c6   :  { %v2052_v59 = vpop.f32.mrb[4].mxu0 }
 0x4c7   :  { %v581_v60 = vadd.f32 %v2052_v59, %v1579_v58  ;;  %v575_v61 = vpop.f32.mrb[5].mxu0 }
 0x4c8   :  { %v576_v62 = vadd.f32 %v1579_v58, %v575_v61 }
 0x4c9   :  { %v585_v0 = vmax.f32 %v581_v60, 0.0 }
 0x4ca   :  { %v584_v63 = vmax.f32 %v576_v62, 0.0 }
 0x4cc   :  { %2085 = vmatprep.mubr.f32.mxu1 %v584_v63 }
 0x4cd   :  { %2086 = vmatmul.mubr.f32.vlgmr.msra.gmra.mrb[4].mxu1 %v585_v0  ;;  %v1583_v0 = vld [vmem:[%s3637_s4 + $0x4] ss:$0 sm:$0xff] }
 0x4ce   :  { %2665 = vmatpush3.bf16.msra.mxu1 %v3234_v15 }
 0x4cf   :  { %2667 = vmatprep.subr.bf16.mxu1 %v3237_v17 }
 0x4d2   :  { %2669 = vmatpush3.bf16.msra.mxu1 %v3237_v17 }
 0x4d3   :  { %2671 = vmatprep.subr.bf16.mxu1 %v3245_v23 }
 0x4d6   :  { %2673 = vmatpush3.bf16.msra.mxu1 %v3245_v23 }
 0x4d7   :  { %2675 = vmatprep.subr.bf16.mxu1 %v3253_v29 }
 0x4da   :  { %2677 = vmatpush3.bf16.msra.mxu1 %v3253_v29 }
 0x4db   :  { %2679 = vmatprep.subr.bf16.mxu1 %v3261_v35 }
 0x4de   :  { %2681 = vmatpush3.bf16.msra.mxu1 %v3261_v35 }
 0x4df   :  { %2683 = vmatprep.subr.bf16.mxu1 %v3269_v41 }
 0x4e2   :  { %2685 = vmatpush3.bf16.msra.mxu1 %v3269_v41 }
 0x4e3   :  { %2687 = vmatprep.subr.bf16.mxu1 %v3277_v45 }
 0x4e6   :  { %2689 = vmatpush3.bf16.msra.mxu1 %v3277_v45 }
 0x4e7   :  { %2691 = vmatprep.subr.bf16.mxu1 %v3305_v49 }
 0x4ea   :  { %2693 = vmatpush3.bf16.msra.mxu1 %v3305_v49 }
 0x4eb   :  { %2727 = vmatprep.subr.bf16.mxu1 %v3234_v15 }
 0x5a0   :  { %v2087_v1 = vpop.f32.mrb[4].mxu1 }
 0x5a1   :  { %v658_v2 = vadd.f32 %v2087_v1, %v3332_v57  ;;  %v652_v4 = vpop.f32.mrb[5].mxu1 }
 0x5a2   :  { %v653_v9 = vadd.f32 %v3332_v57, %v652_v4 }
 0x5a3   :  { %v662_v10 = vmul.f32 0.06940195, %v658_v2 }
 0x5a4   :  { %v661_v13 = vmul.f32 0.06940195, %v653_v9 }
 0x5a5   :  { %v664_v14 = vsub.f32 %v500_v56, %v662_v10  ;;  %v845_v56 = vmul.f32 0.107104756, %v843_v51 }
 0x5a6   :  { %v663_v21 = vsub.f32 %v499_v55, %v661_v13 }
 0x5a7   :  { %v666_v22 = vmul.f32 1.0072349, %v664_v14 }
 0x5a8   :  { %v665_v24 = vmul.f32 1.0072349, %v663_v21 }
 0x5a9   :  { %v673_v25 = vadd.f32 %v671_v18, %v666_v22  ;;  %v1019_v18 = vld [vmem:[#allocation7 + $0x48] sm:$0xff]  ;;  %v1018_v22 = vld [vmem:[#allocation7 + $0x40] sm:$0xff] }
 0x5aa   :  { %v672_v27 = vadd.f32 %v670_v11, %v665_v24 }
 0x5ab   :  { %v675_v30 = vsel %vm101_vm0, %v3343_v19, %v673_v25 }
 0x5ac   :  { %v674_v28 = vsel %vm101_vm0, %v3340_v16, %v672_v27  ;;  %v1021_v27 = vmul.f32 0.092890106, %v1019_v18 }
 0x5ad   :  { %2120 = vmatprep.mubr.f32.mxu0 %v674_v28 }
 0x5ae   :  { %2121 = vmatmul.mubr.f32.vlgmr.msra.gmra.mrb[6].mxu0 %v675_v30 }
 0x5af   :  { %2697 = vmatpush3.bf16.msra.mxu0 %v3222_v3 }
 0x5b0   :  { %2699 = vmatprep.subr.bf16.mxu0 %v3224_v5 }
 0x5b3   :  { %2701 = vmatpush3.bf16.msra.mxu0 %v3224_v5 }
 0x5b4   :  { %2703 = vmatprep.subr.bf16.mxu0 %v3229_v8 }
 0x5b7   :  { %2705 = vmatpush3.bf16.msra.mxu0 %v3229_v8 }
 0x5b8   :  { %2707 = vmatprep.subr.bf16.mxu0 %v3240_v20 }
 0x5bb   :  { %2709 = vmatpush3.bf16.msra.mxu0 %v3240_v20 }
 0x5bc   :  { %2711 = vmatprep.subr.bf16.mxu0 %v3249_v26 }
 0x5bf   :  { %2713 = vmatpush3.bf16.msra.mxu0 %v3249_v26 }
 0x5c0   :  { %2715 = vmatprep.subr.bf16.mxu0 %v3257_v32 }
 0x5c3   :  { %2717 = vmatpush3.bf16.msra.mxu0 %v3257_v32 }
 0x5c4   :  { %2719 = vmatprep.subr.bf16.mxu0 %v3265_v38 }
 0x5c7   :  { %2721 = vmatpush3.bf16.msra.mxu0 %v3265_v38 }
 0x5c8   :  { %2723 = vmatprep.subr.bf16.mxu0 %v3273_v44 }
 0x5cb   :  { %2725 = vmatpush3.bf16.msra.mxu0 %v3273_v44 }
 0x5cc   :  { %2759 = vmatprep.subr.bf16.mxu0 %v3222_v3 }
 0x681   :  { %v2122_v33 = vpop.f32.mrb[6].mxu0 }
 0x682   :  { %v756_v34 = vadd.f32 %v2122_v33, %v1581_v31  ;;  %v750_v36 = vpop.f32.mrb[7].mxu0 }
 0x683   :  { %v751_v37 = vadd.f32 %v1581_v31, %v750_v36 }
 0x684   :  { %v760_v40 = vmax.f32 %v756_v34, 0.0 }
 0x685   :  { %v759_v39 = vmax.f32 %v751_v37, 0.0 }
 0x687   :  { %2155 = vmatprep.mubr.f32.mxu1 %v759_v39 }
 0x688   :  { %2156 = vmatmul.mubr.f32.vlgmr.msra.gmra.mrb[6].mxu1 %v760_v40  ;;  %v1585_v40 = vld [vmem:[%s3637_s4 + $0x5] ss:$0 sm:$0xff] }
 0x689   :  { %2729 = vmatpush3.bf16.msra.mxu1 %v3234_v15 }
 0x68a   :  { %2731 = vmatprep.subr.bf16.mxu1 %v3237_v17 }
 0x68d   :  { %2733 = vmatpush3.bf16.msra.mxu1 %v3237_v17 }
 0x68e   :  { %2735 = vmatprep.subr.bf16.mxu1 %v3245_v23 }
 0x691   :  { %2737 = vmatpush3.bf16.msra.mxu1 %v3245_v23 }
 0x692   :  { %2739 = vmatprep.subr.bf16.mxu1 %v3253_v29 }
 0x695   :  { %2741 = vmatpush3.bf16.msra.mxu1 %v3253_v29 }
 0x696   :  { %2743 = vmatprep.subr.bf16.mxu1 %v3261_v35 }
 0x699   :  { %2745 = vmatpush3.bf16.msra.mxu1 %v3261_v35 }
 0x69a   :  { %2747 = vmatprep.subr.bf16.mxu1 %v3269_v41 }
 0x69d   :  { %2749 = vmatpush3.bf16.msra.mxu1 %v3269_v41 }
 0x69e   :  { %2751 = vmatprep.subr.bf16.mxu1 %v3277_v45 }
 0x6a1   :  { %2753 = vmatpush3.bf16.msra.mxu1 %v3277_v45 }
 0x6a2   :  { %2755 = vmatprep.subr.bf16.mxu1 %v3305_v49 }
 0x6a5   :  { %2757 = vmatpush3.bf16.msra.mxu1 %v3305_v49 }
 0x6a6   :  { %2791 = vmatprep.subr.bf16.mxu1 %v3234_v15 }
 0x75b   :  { %v2157_v42 = vpop.f32.mrb[6].mxu1 }
 0x75c   :  { %v833_v43 = vadd.f32 %v2157_v42, %v3332_v57  ;;  %v827_v46 = vpop.f32.mrb[7].mxu1 }
 0x75d   :  { %v828_v48 = vadd.f32 %v3332_v57, %v827_v46 }
 0x75e   :  { %v837_v50 = vmul.f32 0.06778996, %v833_v43 }
 0x75f   :  { %v836_v52 = vmul.f32 0.06778996, %v828_v48 }
 0x760   :  { %v839_v53 = vsub.f32 %v675_v30, %v837_v50  ;;  %v1020_v30 = vmul.f32 0.092890106, %v1018_v22 }
 0x761   :  { %v838_v55 = vsub.f32 %v674_v28, %v836_v52 }
 0x762   :  { %v841_v58 = vmul.f32 1.0057856, %v839_v53 }
 0x763   :  { %v840_v59 = vmul.f32 1.0057856, %v838_v55 }
 0x764   :  { %v848_v60 = vadd.f32 %v846_v54, %v841_v58  ;;  %v1194_v54 = vld [vmem:[#allocation7 + $0x58] sm:$0xff]  ;;  %v1193_v58 = vld [vmem:[#allocation7 + $0x50] sm:$0xff] }
 0x765   :  { %v847_v61 = vadd.f32 %v845_v56, %v840_v59 }
 0x766   :  { %v850_v63 = vsel %vm101_vm0, %v3343_v19, %v848_v60 }
 0x767   :  { %v849_v62 = vsel %vm101_vm0, %v3340_v16, %v847_v61  ;;  %v1196_v61 = vmul.f32 0.07606389, %v1194_v54 }
 0x768   :  { %2190 = vmatprep.mubr.f32.mxu0 %v849_v62 }
 0x769   :  { %2191 = vmatmul.mubr.f32.vlgmr.msra.gmra.mrb[8].mxu0 %v850_v63 }
 0x76a   :  { %2761 = vmatpush3.bf16.msra.mxu0 %v3222_v3 }
 0x76b   :  { %2763 = vmatprep.subr.bf16.mxu0 %v3224_v5 }
 0x76e   :  { %2765 = vmatpush3.bf16.msra.mxu0 %v3224_v5 }
 0x76f   :  { %2767 = vmatprep.subr.bf16.mxu0 %v3229_v8 }
 0x772   :  { %2769 = vmatpush3.bf16.msra.mxu0 %v3229_v8 }
 0x773   :  { %2771 = vmatprep.subr.bf16.mxu0 %v3240_v20 }
 0x776   :  { %2773 = vmatpush3.bf16.msra.mxu0 %v3240_v20 }
 0x777   :  { %2775 = vmatprep.subr.bf16.mxu0 %v3249_v26 }
 0x77a   :  { %2777 = vmatpush3.bf16.msra.mxu0 %v3249_v26 }
 0x77b   :  { %2779 = vmatprep.subr.bf16.mxu0 %v3257_v32 }
 0x77e   :  { %2781 = vmatpush3.bf16.msra.mxu0 %v3257_v32 }
 0x77f   :  { %2783 = vmatprep.subr.bf16.mxu0 %v3265_v38 }
 0x782   :  { %2785 = vmatpush3.bf16.msra.mxu0 %v3265_v38 }
 0x783   :  { %2787 = vmatprep.subr.bf16.mxu0 %v3273_v44 }
 0x786   :  { %2789 = vmatpush3.bf16.msra.mxu0 %v3273_v44 }
 0x787   :  { %2823 = vmatprep.subr.bf16.mxu0 %v3222_v3 }
 0x83c   :  { %v2192_v1 = vpop.f32.mrb[8].mxu0 }
 0x83d   :  { %v931_v2 = vadd.f32 %v2192_v1, %v1583_v0  ;;  %v925_v4 = vpop.f32.mrb[9].mxu0 }
 0x83e   :  { %v926_v6 = vadd.f32 %v1583_v0, %v925_v4 }
 0x83f   :  { %v935_v10 = vmax.f32 %v931_v2, 0.0 }
 0x840   :  { %v934_v9 = vmax.f32 %v926_v6, 0.0 }
 0x842   :  { %2225 = vmatprep.mubr.f32.mxu1 %v934_v9 }
 0x843   :  { %2226 = vmatmul.mubr.f32.vlgmr.msra.gmra.mrb[8].mxu1 %v935_v10 }
 0x844   :  { %2793 = vmatpush3.bf16.msra.mxu1 %v3234_v15 }
 0x845   :  { %2795 = vmatprep.subr.bf16.mxu1 %v3237_v17 }
 0x848   :  { %2797 = vmatpush3.bf16.msra.mxu1 %v3237_v17 }
 0x849   :  { %2799 = vmatprep.subr.bf16.mxu1 %v3245_v23 }
 0x84c   :  { %2801 = vmatpush3.bf16.msra.mxu1 %v3245_v23 }
 0x84d   :  { %2803 = vmatprep.subr.bf16.mxu1 %v3253_v29 }
 0x850   :  { %2805 = vmatpush3.bf16.msra.mxu1 %v3253_v29 }
 0x851   :  { %2807 = vmatprep.subr.bf16.mxu1 %v3261_v35 }
 0x854   :  { %2809 = vmatpush3.bf16.msra.mxu1 %v3261_v35 }
 0x855   :  { %2811 = vmatprep.subr.bf16.mxu1 %v3269_v41 }
 0x858   :  { %2813 = vmatpush3.bf16.msra.mxu1 %v3269_v41 }
 0x859   :  { %2815 = vmatprep.subr.bf16.mxu1 %v3277_v45 }
 0x85c   :  { %2817 = vmatpush3.bf16.msra.mxu1 %v3277_v45 }
 0x85d   :  { %2819 = vmatprep.subr.bf16.mxu1 %v3305_v49 }
 0x860   :  { %2821 = vmatpush3.bf16.msra.mxu1 %v3305_v49 }
 0x861   :  { %2855 = vmatprep.subr.bf16.mxu1 %v3234_v15 }
 0x916   :  { %v2227_v12 = vpop.f32.mrb[8].mxu1 }
 0x917   :  { %v1008_v13 = vadd.f32 %v2227_v12, %v3332_v57  ;;  %v1002_v14 = vpop.f32.mrb[9].mxu1 }
 0x918   :  { %v1003_v21 = vadd.f32 %v3332_v57, %v1002_v14 }
 0x919   :  { %v1012_v11 = vmul.f32 0.06548227, %v1008_v13 }
 0x91a   :  { %v1011_v24 = vmul.f32 0.06548227, %v1003_v21 }
 0x91b   :  { %v1014_v25 = vsub.f32 %v850_v63, %v1012_v11  ;;  %v1195_v63 = vmul.f32 0.07606389, %v1193_v58 }
 0x91c   :  { %v1013_v28 = vsub.f32 %v849_v62, %v1011_v24 }
 0x91d   :  { %v1016_v31 = vmul.f32 1.0043424, %v1014_v25  ;;  %v1589_v25 = vld [vmem:[%s3637_s4 + $0x7] ss:$0 sm:$0xff] }
 0x91e   :  { %v1015_v33 = vmul.f32 1.0043424, %v1013_v28 }
 0x91f   :  { %v1023_v34 = vadd.f32 %v1021_v27, %v1016_v31 }
 0x920   :  { %v1022_v36 = vadd.f32 %v1020_v30, %v1015_v33 }
 0x921   :  { %v1025_v39 = vsel %vm101_vm0, %v3343_v19, %v1023_v34 }
 0x922   :  { %v1024_v37 = vsel %vm101_vm0, %v3340_v16, %v1022_v36 }
 0x923   :  { %2260 = vmatprep.mubr.f32.mxu0 %v1024_v37 }
 0x924   :  { %2261 = vmatmul.mubr.f32.vlgmr.msra.gmra.mrb[10].mxu0 %v1025_v39 }
 0x925   :  { %2825 = vmatpush3.bf16.msra.mxu0 %v3222_v3 }
 0x926   :  { %2827 = vmatprep.subr.bf16.mxu0 %v3224_v5 }
 0x929   :  { %2829 = vmatpush3.bf16.msra.mxu0 %v3224_v5 }
 0x92a   :  { %2831 = vmatprep.subr.bf16.mxu0 %v3229_v8 }
 0x92d   :  { %2833 = vmatpush3.bf16.msra.mxu0 %v3229_v8 }
 0x92e   :  { %2835 = vmatprep.subr.bf16.mxu0 %v3240_v20 }
 0x931   :  { %2837 = vmatpush3.bf16.msra.mxu0 %v3240_v20 }
 0x932   :  { %2839 = vmatprep.subr.bf16.mxu0 %v3249_v26 }
 0x935   :  { %2841 = vmatpush3.bf16.msra.mxu0 %v3249_v26 }
 0x936   :  { %2843 = vmatprep.subr.bf16.mxu0 %v3257_v32 }
 0x939   :  { %2845 = vmatpush3.bf16.msra.mxu0 %v3257_v32 }
 0x93a   :  { %2847 = vmatprep.subr.bf16.mxu0 %v3265_v38 }
 0x93d   :  { %2849 = vmatpush3.bf16.msra.mxu0 %v3265_v38 }
 0x93e   :  { %2851 = vmatprep.subr.bf16.mxu0 %v3273_v44 }
 0x941   :  { %2853 = vmatpush3.bf16.msra.mxu0 %v3273_v44 }
 0x942   :  { %2887 = vmatprep.subr.bf16.mxu0 %v3222_v3 }
 0x9f7   :  { %v2262_v42 = vpop.f32.mrb[10].mxu0 }
 0x9f8   :  { %v1106_v43 = vadd.f32 %v2262_v42, %v1585_v40  ;;  %v1100_v46 = vpop.f32.mrb[11].mxu0 }
 0x9f9   :  { %v1101_v47 = vadd.f32 %v1585_v40, %v1100_v46  ;;  %v1544_v40 = vld [vmem:[#allocation7 + $0x78] sm:$0xff]  ;;  %v1543_v46 = vld [vmem:[#allocation7 + $0x70] sm:$0xff] }
 0x9fa   :  { %v1110_v50 = vmax.f32 %v1106_v43, 0.0 }
 0x9fb   :  { %v1109_v48 = vmax.f32 %v1101_v47, 0.0 }
 0x9fd   :  { %2295 = vmatprep.mubr.f32.mxu1 %v1109_v48 }
 0x9fe   :  { %2296 = vmatmul.mubr.f32.vlgmr.msra.gmra.mrb[10].mxu1 %v1110_v50  ;;  %v1546_v50 = vmul.f32 0.0, %v1544_v40 }
 0x9ff   :  { %2857 = vmatpush3.bf16.msra.mxu1 %v3234_v15 }
 0xa00   :  { %2859 = vmatprep.subr.bf16.mxu1 %v3237_v17 }
 0xa03   :  { %2861 = vmatpush3.bf16.msra.mxu1 %v3237_v17 }
 0xa04   :  { %2863 = vmatprep.subr.bf16.mxu1 %v3245_v23 }
 0xa07   :  { %2865 = vmatpush3.bf16.msra.mxu1 %v3245_v23 }
 0xa08   :  { %2867 = vmatprep.subr.bf16.mxu1 %v3253_v29 }
 0xa0b   :  { %2869 = vmatpush3.bf16.msra.mxu1 %v3253_v29 }
 0xa0c   :  { %2871 = vmatprep.subr.bf16.mxu1 %v3261_v35 }
 0xa0f   :  { %2873 = vmatpush3.bf16.msra.mxu1 %v3261_v35 }
 0xa10   :  { %2875 = vmatprep.subr.bf16.mxu1 %v3269_v41 }
 0xa13   :  { %2877 = vmatpush3.bf16.msra.mxu1 %v3269_v41 }
 0xa14   :  { %2879 = vmatprep.subr.bf16.mxu1 %v3277_v45 }
 0xa17   :  { %2881 = vmatpush3.bf16.msra.mxu1 %v3277_v45 }
 0xa18   :  { %2883 = vmatprep.subr.bf16.mxu1 %v3305_v49 }
 0xa1b   :  { %2885 = vmatpush3.bf16.msra.mxu1 %v3305_v49 }
 0xa1c   :  { %2919 = vmatprep.subr.bf16.mxu1 %v3234_v15 }
 0xad1   :  { %v2297_v51 = vpop.f32.mrb[10].mxu1 }
 0xad2   :  { %v1183_v52 = vadd.f32 %v2297_v51, %v3332_v57  ;;  %v1177_v53 = vpop.f32.mrb[11].mxu1 }
 0xad3   :  { %v1178_v55 = vadd.f32 %v3332_v57, %v1177_v53 }
 0xad4   :  { %v1187_v56 = vmul.f32 0.061638553, %v1183_v52  ;;  %v1545_v52 = vmul.f32 0.0, %v1543_v46 }
 0xad5   :  { %v1186_v59 = vmul.f32 0.061638553, %v1178_v55 }
 0xad6   :  { %v1189_v60 = vsub.f32 %v1025_v39, %v1187_v56 }
 0xad7   :  { %v1188_v62 = vsub.f32 %v1024_v37, %v1186_v59 }
 0xad8   :  { %v1191_v0 = vmul.f32 1.0029055, %v1189_v60 }
 0xad9   :  { %v1190_v1 = vmul.f32 1.0029055, %v1188_v62 }
 0xada   :  { %v1198_v2 = vadd.f32 %v1196_v61, %v1191_v0 }
 0xadb   :  { %v1197_v4 = vadd.f32 %v1195_v63, %v1190_v1 }
 0xadc   :  { %v1200_v9 = vsel %vm101_vm0, %v3343_v19, %v1198_v2 }
 0xadd   :  { %v1199_v6 = vsel %vm101_vm0, %v3340_v16, %v1197_v4 }
 0xade   :  { %2330 = vmatprep.mubr.f32.mxu0 %v1199_v6 }
 0xadf   :  { %2331 = vmatmul.mubr.f32.vlgmr.msra.gmra.mrb[12].mxu0 %v1200_v9 }
 0xae0   :  { %2889 = vmatpush3.bf16.msra.mxu0 %v3222_v3  ;;  %v1587_v3 = vld [vmem:[%s3637_s4 + $0x6] ss:$0 sm:$0xff]  ;;  %s3109_s4 = smov [#allocation11]  }
 0xae1   :  { %2891 = vmatprep.subr.bf16.mxu0 %v3224_v5  ;;  %s1558_s8 = sshll.u32 %s3109_s4, 4  ;;  %s1559_s8 = int_to_ptr.vmem [resolvable:$true] %s1558_s8 }
 0xae2   :  { %s3070_s9 = scalar_lea.vmem %s1559_s8, 256  ;;  %p3075_p13 = scmp.lt.s32.totalorder %s1559_s8, %s1559_s8 }
 0xae3   :  { %p3071_p12 = scmp.ne.s32.totalorder %s1559_s8, %s3070_s9  ;;  %p3076_p0 = scmp.lt.s32.totalorder %s3070_s9, %s3070_s9 }
 0xae4   :  { %2893 = vmatpush3.bf16.msra.mxu0 %v3224_v5 }
 0xae5   :  { %2895 = vmatprep.subr.bf16.mxu0 %v3229_v8  ;;  %p3077_p1 = por %p3076_p0, %p3075_p13 }
 0xae7   :  { %p3078_p2 = pnand %p3077_p1, %p3071_p12 }
 0xae8   :  { %2897 = vmatpush3.bf16.msra.mxu0 %v3229_v8 }
 0xae9   :  { %2899 = vmatprep.subr.bf16.mxu0 %v3240_v20 }
 0xaec   :  { %2901 = vmatpush3.bf16.msra.mxu0 %v3240_v20 }
 0xaed   :  { %2903 = vmatprep.subr.bf16.mxu0 %v3249_v26 }
 0xaf0   :  { %2905 = vmatpush3.bf16.msra.mxu0 %v3249_v26 }
 0xaf1   :  { %2907 = vmatprep.subr.bf16.mxu0 %v3257_v32 }
 0xaf4   :  { %2909 = vmatpush3.bf16.msra.mxu0 %v3257_v32 }
 0xaf5   :  { %2911 = vmatprep.subr.bf16.mxu0 %v3265_v38 }
 0xaf8   :  { %2913 = vmatpush3.bf16.msra.mxu0 %v3265_v38  ;;  %v1368_v38 = vld [vmem:[#allocation7 + $0x60] sm:$0xff] }
 0xaf9   :  { %2915 = vmatprep.subr.bf16.mxu0 %v3273_v44  ;;  %v1370_v18 = vmul.f32 0.054248106, %v1368_v38 }
 0xafc   :  { %2917 = vmatpush3.bf16.msra.mxu0 %v3273_v44 }
 0xbb2   :  { %v2332_v5 = vpop.f32.mrb[12].mxu0 }
 0xbb3   :  { %v1281_v8 = vadd.f32 %v2332_v5, %v1587_v3  ;;  %v1275_v20 = vpop.f32.mrb[13].mxu0 }
 0xbb4   :  { %v1276_v26 = vadd.f32 %v1587_v3, %v1275_v20 }
 0xbb5   :  { %v1285_v12 = vmax.f32 %v1281_v8, 0.0 }
 0xbb6   :  { %v1284_v10 = vmax.f32 %v1276_v26, 0.0 }
 0xbb8   :  { %2365 = vmatprep.mubr.f32.mxu1 %v1284_v10 }
 0xbb9   :  { %2366 = vmatmul.mubr.f32.vlgmr.msra.gmra.mrb[12].mxu1 %v1285_v12 }
 0xbba   :  { %2921 = vmatpush3.bf16.msra.mxu1 %v3234_v15 }
 0xbbb   :  { %2923 = vmatprep.subr.bf16.mxu1 %v3237_v17 }
 0xbbe   :  { %2925 = vmatpush3.bf16.msra.mxu1 %v3237_v17 }
 0xbbf   :  { %2927 = vmatprep.subr.bf16.mxu1 %v3245_v23 }
 0xbc2   :  { %2929 = vmatpush3.bf16.msra.mxu1 %v3245_v23 }
 0xbc3   :  { %2931 = vmatprep.subr.bf16.mxu1 %v3253_v29 }
 0xbc6   :  { %2933 = vmatpush3.bf16.msra.mxu1 %v3253_v29  ;;  %v1369_v29 = vld [vmem:[#allocation7 + $0x68] sm:$0xff] }
 0xbc7   :  { %2935 = vmatprep.subr.bf16.mxu1 %v3261_v35 }
 0xbca   :  { %2937 = vmatpush3.bf16.msra.mxu1 %v3261_v35 }
 0xbcb   :  { %2939 = vmatprep.subr.bf16.mxu1 %v3269_v41 }
 0xbce   :  { %2941 = vmatpush3.bf16.msra.mxu1 %v3269_v41  ;;  %v1371_v41 = vmul.f32 0.054248106, %v1369_v29 }
 0xbcf   :  { %2943 = vmatprep.subr.bf16.mxu1 %v3277_v45 }
 0xbd2   :  { %2945 = vmatpush3.bf16.msra.mxu1 %v3277_v45 }
 0xbd3   :  { %2947 = vmatprep.subr.bf16.mxu1 %v3305_v49 }
 0xbd6   :  { %2949 = vmatpush3.bf16.msra.mxu1 %v3305_v49 }
 0xc8c   :  { %v2367_v15 = vpop.f32.mrb[12].mxu1 }
 0xc8d   :  { %v1358_v17 = vadd.f32 %v2367_v15, %v3332_v57  ;;  %v1352_v23 = vpop.f32.mrb[13].mxu1 }
 0xc8e   :  { %v1353_v32 = vadd.f32 %v3332_v57, %v1352_v23 }
 0xc8f   :  { %v1362_v35 = vmul.f32 0.05335184, %v1358_v17 }
 0xc90   :  { %v1361_v44 = vmul.f32 0.05335184, %v1353_v32 }
 0xc91   :  { %v1364_v13 = vsub.f32 %v1200_v9, %v1362_v35 }
 0xc92   :  { %v1363_v14 = vsub.f32 %v1199_v6, %v1361_v44 }
 0xc93   :  { %v1366_v21 = vmul.f32 1.0014747, %v1364_v13 }
 0xc94   :  { %v1365_v45 = vmul.f32 1.0014747, %v1363_v14 }
 0xc95   :  { %v1373_v11 = vadd.f32 %v1371_v41, %v1366_v21 }
 0xc96   :  { %v1372_v22 = vadd.f32 %v1370_v18, %v1365_v45 }
 0xc97   :  { %v1375_v24 = vsel %vm101_vm0, %v3343_v19, %v1373_v11 }
 0xc98   :  { %v1374_v49 = vsel %vm101_vm0, %v3340_v16, %v1372_v22 }
 0xc99   :  { %2400 = vmatprep.mubr.f32.mxu0 %v1374_v49 }
 0xc9a   :  { %2401 = vmatmul.mubr.f32.vlgmr.msra.gmra.mrb[14].mxu0 %v1375_v24 }
 0xd6d   :  { %v2402_v27 = vpop.f32.mrb[14].mxu0 }
 0xd6e   :  { %v1456_v28 = vadd.f32 %v2402_v27, %v1589_v25  ;;  %v1450_v30 = vpop.f32.mrb[15].mxu0 }
 0xd6f   :  { %v1451_v31 = vadd.f32 %v1589_v25, %v1450_v30 }
 0xd70   :  { %v1460_v34 = vmax.f32 %v1456_v28, 0.0 }
 0xd71   :  { %v1459_v33 = vmax.f32 %v1451_v31, 0.0 }
 0xd73   :  { %2435 = vmatprep.mubr.f32.mxu1 %v1459_v33 }
 0xd74   :  { %2436 = vmatmul.mubr.f32.vlgmr.msra.gmra.mrb[14].mxu1 %v1460_v34 }
 0xe47   :  { %v2437_v36 = vpop.f32.mrb[14].mxu1 }
 0xe48   :  { %v1533_v37 = vadd.f32 %v2437_v36, %v3332_v57  ;;  %v1527_v39 = vpop.f32.mrb[15].mxu1 }
 0xe49   :  { %v1528_v42 = vadd.f32 %v3332_v57, %v1527_v39 }
 0xe4a   :  { %v1537_v43 = vmul.f32 0.01, %v1533_v37 }
 0xe4b   :  { %v1536_v47 = vmul.f32 0.01, %v1528_v42 }
 0xe4c   :  { %v1539_v48 = vsub.f32 %v1375_v24, %v1537_v43 }
 0xe4d   :  { %v1538_v51 = vsub.f32 %v1374_v49, %v1536_v47 }
 0xe4e   :  { %v1541_v53 = vmul.f32 1.00005, %v1539_v48 }
 0xe4f   :  { %v1540_v54 = vmul.f32 1.00005, %v1538_v51 }
 0xe50   :  { %v1548_v55 = vadd.f32 %v1546_v50, %v1541_v53 }
 0xe51   :  { %v1547_v56 = vadd.f32 %v1545_v52, %v1540_v54 }
 0xe52   :  { %v1550_v58 = vsel %vm101_vm0, %v3343_v19, %v1548_v55 }
 0xe53   :  { %v1549_v57 = vsel %vm101_vm0, %v3340_v16, %v1547_v56  ;;  %1552 = vst [vmem:[#allocation11 + $0x8] sm:$0xff] %v1550_v58 }
 0xe54   :  { %1551 = vst [vmem:[#allocation11] sm:$0xff] %v1549_v57 }
 0xe55   :  { %3081 = shalt.err (!%p3078_p2)
}
 0xe56   :  { %s3082_s14 = scalar_lea.hbm %s3640_s7, 256 }
 0xe57   :  { %p3083_p3 = scmp.ne.s32.totalorder %s3640_s7, %s3082_s14  ;;  %p3086_p4 = scmp.lt.u32.totalorder %s3082_s14, %s3640_s7 }
 0xe59   :  { %p3088_p5 = pnand %p3086_p4, %p3083_p3 }
 0xe5b   :  { %3091 = shalt.err (!%p3088_p5)
}
 0xe5c   :  { %1564 = dma.vmem_to_hbm [thread:$0]  %s1559_s8, 256, %s3640_s7, [#allocation4], %s3101_s11, %s3101_s11, %s3102_s12  }
 0xe5d   :  { %3098 = dma.done.wait [#allocation4], 256  }
 0xe5e   :  { %3099 = vsyncadd [#allocation4], 4294967040 }
 0xe5f   :  { %1568 = vsyncpa [#allocation3], 1 }
 0xe60   :  { %1569 = vsyncpa [#allocation6], 1 }
 0xe61   :  { %1570 = vsyncpa [#allocation9], 1 }
 0xe62   :  { %1571 = vsyncpa [#allocation4], 1 }

</bundles_post_ra>
